<compile_context>
chip_gen: v6e
topology: v6e:2x2x1
jax: 0.10.0
libtpu: 0.0.40
codegen_flags: <defaults>
</compile_context>

<pallas_src>
import functools

import jax
import jax.numpy as jnp
from jax.experimental import pallas as pl
from jax.experimental.pallas import tpu as pltpu

# Row/column tap selectors: for output parity p (0/1) and 2x2 sub-kernel tap t (0/1),
# _SEL[p][t] lists which of the original 3 conv taps collapse onto that tap.
_SEL = (((0,), (1, 2)),     # parity 0
        ((0, 1), (2,)))     # parity 1


def _stack_weights(w):
    """(Co, Ci, 3, 3) conv weight -> (9, 4*Co, Ci) per-offset, parity-stacked weights.

    For window offset (r, c) in {0,1,2}^2 over the zero-padded input, the (4*Co, Ci)
    slab holds, for each output parity (a, b) (M-block index a*2+b), the combined
    2x2 sub-kernel tap (u, v) = (r-a, c-b) when valid, else zeros.  Taps are combined
    in f32 *before* the bf16 cast, so the decomposition is numerically exact.
    """
    Co, Ci = w.shape[0], w.shape[1]
    per_offset = []
    for r in range(3):
        for c in range(3):
            blocks = []
            for a in range(2):
                for b in range(2):
                    u, v = r - a, c - b
                    k = jnp.zeros((Co, Ci), w.dtype)
                    if 0 <= u <= 1 and 0 <= v <= 1:
                        for ky in _SEL[a][u]:
                            for kx in _SEL[b][v]:
                                k = k + w[:, :, ky, kx]
                    blocks.append(k)
            per_offset.append(jnp.concatenate(blocks, axis=0))     # (4*Co, Ci)
    return jnp.stack(per_offset, axis=0)                           # (9, 4*Co, Ci)


def _upsample_conv_kernel(H, W, x_ref, w_ref, b_ref, o_ref):
    # x_ref : (Ci, (H+3)*(W+2))   bf16 zero-padded input, spatial flattened onto lanes
    # w_ref : (9, 4*Co, Ci)       bf16 parity-stacked weights, one slab per offset
    # b_ref : (4*Co, 1)           f32 parity-tiled bias
    # o_ref : (4*Co, H*(W+2))     f32 parity-major output (doubles as the accumulator)
    L = W + 2
    n = H * L
    # Accumulator = output ref, seeded with the bias (no zeros pass + final add).
    o_ref[...] = jnp.broadcast_to(b_ref[...], o_ref.shape)
    for r in range(3):
        for c in range(3):
            # Each of the 9 distinct shifted windows is sliced exactly once (static
            # lane offset) and consumed by a single MXU matmul whose M dimension
            # carries all 4 output parities; tap accumulation happens on the MXU.
            win = x_ref[:, pl.ds(r * L + c, n)]                       # (Ci, n) bf16
            o_ref[...] += jnp.dot(w_ref[3 * r + c], win,
                                  preferred_element_type=jnp.float32)


def _vmem_limit_bytes():
    # Per-generation scoped-VMEM budget with headroom for compiler-internal scratch:
    # ~105-110 MiB on 128-MiB parts (v5e/v6e), ~52 MiB on 64-MiB parts (v7x).
    try:
        cap = int(pltpu.get_tpu_info().vmem_capacity_bytes)
    except Exception:
        cap = 64 * 1024 * 1024
    return min(int(cap * 0.82), 110 * 1024 * 1024)


def upsample_block(x, weight, bias):
    """x: (B, C, H, W) f32, weight: (C, C, 3, 3), bias: (C,) -> (B, C, 2H, 2W) f32."""
    B, C, H, W = x.shape
    L = W + 2
    n_in = (H + 3) * L
    n_out = H * L
    # Padding invariant: the last window offset (2, 2) reaches flat index
    # (H+2)*L + 1, which must stay inside the 1-top/2-bottom/1-left/1-right zero pad.
    assert (H + 2) * L + 1 < n_in, "zero pad must absorb the ragged window spill"

    # Host-side prep (cheap, XLA-fused): pad, flatten spatial onto lanes, cast bf16 once.
    xpad = jnp.pad(x, ((0, 0), (0, 0), (1, 2), (1, 1))).astype(jnp.bfloat16)
    xflat = xpad.reshape(B, C, n_in)

    w9 = _stack_weights(weight).astype(jnp.bfloat16)                 # (9, 4C, C)
    b4 = jnp.tile(bias, 4).reshape(4 * C, 1).astype(jnp.float32)     # (4C, 1)

    kernel = functools.partial(_upsample_conv_kernel, H, W)
    out_p = pl.pallas_call(
        kernel,
        out_shape=jax.ShapeDtypeStruct((B, 4 * C, n_out), jnp.float32),
        grid_spec=pltpu.PrefetchScalarGridSpec(
            num_scalar_prefetch=0,
            grid=(B,),
            in_specs=[
                pl.BlockSpec((None, C, n_in), lambda b: (b, 0, 0)),   # per-batch input
                pl.BlockSpec((9, 4 * C, C), lambda b: (0, 0, 0)),     # invariant weights
                pl.BlockSpec((4 * C, 1), lambda b: (0, 0)),           # invariant bias
            ],
            out_specs=pl.BlockSpec((None, 4 * C, n_out), lambda b: (b, 0, 0)),
        ),
        compiler_params=pltpu.CompilerParams(
            dimension_semantics=("parallel",),            # batch steps shard across cores
            vmem_limit_bytes=_vmem_limit_bytes(),         # per-generation VMEM budget
        ),
    )(xflat, w9, b4)

    # Parity-major (B, (a,b), C, H, L) -> drop ragged lanes -> interleave to NCHW.
    # TODO(synk): keep the parity-major layout for the downstream consumer (or store
    # the row parity via sublane-offset stores in-kernel) to avoid this extra HBM pass.
    # TODO(synk): for production C/H/W add an H-row-tile grid axis (3-row halo via
    # element-offset index_map or manual DMA) so per-step blocks fit v7x's 64 MiB VMEM.
    out = out_p.reshape(B, 2, 2, C, H, L)[..., :W]
    out = out.transpose(0, 3, 4, 1, 5, 2).reshape(B, C, 2 * H, 2 * W)
    return out


def reference(x, weight, bias):
    """Pure-JAX reference matching the PyTorch UpsampleBlock forward."""
    xu = jnp.repeat(jnp.repeat(x, 2, axis=2), 2, axis=3)      # nearest, scale_factor=2
    y = jax.lax.conv_general_dilated(
        xu, weight, window_strides=(1, 1), padding=((1, 1), (1, 1)),
        dimension_numbers=('NCHW', 'OIHW', 'NCHW'))
    return y + bias.reshape(1, -1, 1, 1)


if __name__ == "__main__":
    B, C, H, W = 2, 16, 16, 16
    key = jax.random.PRNGKey(0)
    kx, kw, kb = jax.random.split(key, 3)
    x = jax.random.normal(kx, (B, C, H, W), jnp.float32)
    fan_in = C * 9
    bound = 1.0 / (fan_in ** 0.5)                 # PyTorch Conv2d default init scale
    weight = jax.random.uniform(kw, (C, C, 3, 3), jnp.float32, -bound, bound)
    bias = jax.random.uniform(kb, (C,), jnp.float32, -bound, bound)

    out = upsample_block(x, weight, bias)
    out = jax.block_until_ready(out)

    ref = reference(x, weight, bias)
    assert out.shape == (B, C, 2 * H, 2 * W)
    max_err = float(jnp.max(jnp.abs(out - ref)))
    # bf16 MXU inputs with fp32 accumulation -> small rounding vs the fp32 reference.
    assert jnp.allclose(out, ref, rtol=5e-2, atol=5e-2), max_err
    print("KERNEL_OK")
</pallas_src>

<mosaic_0001>
module attributes {stable_mosaic.version = 11 : i64} {
  func.func @_upsample_conv_kernel(%arg0: i32, %arg1: memref<1x16x342xbf16, #tpu.memory_space<vmem>>, %arg2: memref<9x64x16xbf16, #tpu.memory_space<vmem>>, %arg3: memref<64x1xf32, #tpu.memory_space<vmem>>, %arg4: memref<1x64x288xf32, #tpu.memory_space<vmem>>) attributes {dimension_semantics = [#tpu.dimension_semantics<parallel>], iteration_bounds = array<i64: 2>, scalar_prefetch = 0 : i64, scratch_operands = 0 : i64, tpu.core_type = #tpu.core_type<tc>, window_params = [{transform_indices = @transform_0, window_bounds = array<i64: 1, 16, 342>}, {pipeline_mode = #tpu.pipeline_mode<synchronous>, transform_indices = @transform_1, window_bounds = array<i64: 9, 64, 16>}, {pipeline_mode = #tpu.pipeline_mode<synchronous>, transform_indices = @transform_2, window_bounds = array<i64: 64, 1>}, {transform_indices = @transform_3, window_bounds = array<i64: 1, 64, 288>}]} {
    %c0 = arith.constant 0 : index
    %c0_0 = arith.constant 0 : index
    %0 = vector.load %arg3[%c0, %c0_0] : memref<64x1xf32, #tpu.memory_space<vmem>>, vector<64x1xf32>
    %1 = vector.shape_cast %0 : vector<64x1xf32> to vector<64x1xf32>
    %2 = vector.broadcast %1 : vector<64x1xf32> to vector<64x288xf32>
    %c0_1 = arith.constant 0 : index
    %c0_2 = arith.constant 0 : index
    %c0_3 = arith.constant 0 : index
    %3 = vector.load %arg4[%c0_1, %c0_2, %c0_3] : memref<1x64x288xf32, #tpu.memory_space<vmem>>, vector<1x64x288xf32>
    %4 = vector.shape_cast %3 : vector<1x64x288xf32> to vector<64x288xf32>
    %5 = vector.shape_cast %2 : vector<64x288xf32> to vector<1x64x288xf32>
    tpu.vector_store %arg4[%c0_1, %c0_2, %c0_3], %5 {strides = array<i32>} : memref<1x64x288xf32, #tpu.memory_space<vmem>>, vector<1x64x288xf32>,
    %c0_4 = arith.constant 0 : index
    %c0_5 = arith.constant 0 : index
    %c0_6 = arith.constant 0 : index
    %6 = vector.load %arg1[%c0_4, %c0_5, %c0_6] : memref<1x16x342xbf16, #tpu.memory_space<vmem>>, vector<1x16x288xbf16>
    %7 = vector.shape_cast %6 : vector<1x16x288xbf16> to vector<16x288xbf16>
    %c0_7 = arith.constant 0 : index
    %c0_8 = arith.constant 0 : index
    %c0_9 = arith.constant 0 : index
    %8 = vector.load %arg4[%c0_7, %c0_8, %c0_9] : memref<1x64x288xf32, #tpu.memory_space<vmem>>, vector<1x64x288xf32>
    %9 = vector.shape_cast %8 : vector<1x64x288xf32> to vector<64x288xf32>
    %c0_10 = arith.constant 0 : index
    %c0_11 = arith.constant 0 : index
    %c0_12 = arith.constant 0 : index
    %10 = vector.load %arg2[%c0_10, %c0_11, %c0_12] : memref<9x64x16xbf16, #tpu.memory_space<vmem>>, vector<1x64x16xbf16>
    %11 = vector.shape_cast %10 : vector<1x64x16xbf16> to vector<64x16xbf16>
    %cst = arith.constant dense<0.000000e+00> : vector<64x288xf32>
    %12 = tpu.matmul %11, %7, %cst {dimension_numbers = #tpu.dot_dimension_numbers<[1], [0], [0], [1], [0, 0, 1, 1], [], []>} : vector<64x16xbf16>, vector<16x288xbf16>, vector<64x288xf32> -> vector<64x288xf32>
    %13 = arith.addf %9, %12 : vector<64x288xf32>
    %c0_13 = arith.constant 0 : index
    %c0_14 = arith.constant 0 : index
    %c0_15 = arith.constant 0 : index
    %14 = vector.load %arg4[%c0_13, %c0_14, %c0_15] : memref<1x64x288xf32, #tpu.memory_space<vmem>>, vector<1x64x288xf32>
    %15 = vector.shape_cast %14 : vector<1x64x288xf32> to vector<64x288xf32>
    %16 = vector.shape_cast %13 : vector<64x288xf32> to vector<1x64x288xf32>
    tpu.vector_store %arg4[%c0_13, %c0_14, %c0_15], %16 {strides = array<i32>} : memref<1x64x288xf32, #tpu.memory_space<vmem>>, vector<1x64x288xf32>,
    %c0_16 = arith.constant 0 : index
    %c0_17 = arith.constant 0 : index
    %c1 = arith.constant 1 : index
    %17 = vector.load %arg1[%c0_16, %c0_17, %c1] : memref<1x16x342xbf16, #tpu.memory_space<vmem>>, vector<1x16x288xbf16>
    %18 = vector.shape_cast %17 : vector<1x16x288xbf16> to vector<16x288xbf16>
    %c0_18 = arith.constant 0 : index
    %c0_19 = arith.constant 0 : index
    %c0_20 = arith.constant 0 : index
    %19 = vector.load %arg4[%c0_18, %c0_19, %c0_20] : memref<1x64x288xf32, #tpu.memory_space<vmem>>, vector<1x64x288xf32>
    %20 = vector.shape_cast %19 : vector<1x64x288xf32> to vector<64x288xf32>
    %c1_21 = arith.constant 1 : index
    %c0_22 = arith.constant 0 : index
    %c0_23 = arith.constant 0 : index
    %21 = vector.load %arg2[%c1_21, %c0_22, %c0_23] : memref<9x64x16xbf16, #tpu.memory_space<vmem>>, vector<1x64x16xbf16>
    %22 = vector.shape_cast %21 : vector<1x64x16xbf16> to vector<64x16xbf16>
    %cst_24 = arith.constant dense<0.000000e+00> : vector<64x288xf32>
    %23 = tpu.matmul %22, %18, %cst_24 {dimension_numbers = #tpu.dot_dimension_numbers<[1], [0], [0], [1], [0, 0, 1, 1], [], []>} : vector<64x16xbf16>, vector<16x288xbf16>, vector<64x288xf32> -> vector<64x288xf32>
    %24 = arith.addf %20, %23 : vector<64x288xf32>
    %c0_25 = arith.constant 0 : index
    %c0_26 = arith.constant 0 : index
    %c0_27 = arith.constant 0 : index
    %25 = vector.load %arg4[%c0_25, %c0_26, %c0_27] : memref<1x64x288xf32, #tpu.memory_space<vmem>>, vector<1x64x288xf32>
    %26 = vector.shape_cast %25 : vector<1x64x288xf32> to vector<64x288xf32>
    %27 = vector.shape_cast %24 : vector<64x288xf32> to vector<1x64x288xf32>
    tpu.vector_store %arg4[%c0_25, %c0_26, %c0_27], %27 {strides = array<i32>} : memref<1x64x288xf32, #tpu.memory_space<vmem>>, vector<1x64x288xf32>,
    %c0_28 = arith.constant 0 : index
    %c0_29 = arith.constant 0 : index
    %c2 = arith.constant 2 : index
    %28 = vector.load %arg1[%c0_28, %c0_29, %c2] : memref<1x16x342xbf16, #tpu.memory_space<vmem>>, vector<1x16x288xbf16>
    %29 = vector.shape_cast %28 : vector<1x16x288xbf16> to vector<16x288xbf16>
    %c0_30 = arith.constant 0 : index
    %c0_31 = arith.constant 0 : index
    %c0_32 = arith.constant 0 : index
    %30 = vector.load %arg4[%c0_30, %c0_31, %c0_32] : memref<1x64x288xf32, #tpu.memory_space<vmem>>, vector<1x64x288xf32>
    %31 = vector.shape_cast %30 : vector<1x64x288xf32> to vector<64x288xf32>
    %c2_33 = arith.constant 2 : index
    %c0_34 = arith.constant 0 : index
    %c0_35 = arith.constant 0 : index
    %32 = vector.load %arg2[%c2_33, %c0_34, %c0_35] : memref<9x64x16xbf16, #tpu.memory_space<vmem>>, vector<1x64x16xbf16>
    %33 = vector.shape_cast %32 : vector<1x64x16xbf16> to vector<64x16xbf16>
    %cst_36 = arith.constant dense<0.000000e+00> : vector<64x288xf32>
    %34 = tpu.matmul %33, %29, %cst_36 {dimension_numbers = #tpu.dot_dimension_numbers<[1], [0], [0], [1], [0, 0, 1, 1], [], []>} : vector<64x16xbf16>, vector<16x288xbf16>, vector<64x288xf32> -> vector<64x288xf32>
    %35 = arith.addf %31, %34 : vector<64x288xf32>
    %c0_37 = arith.constant 0 : index
    %c0_38 = arith.constant 0 : index
    %c0_39 = arith.constant 0 : index
    %36 = vector.load %arg4[%c0_37, %c0_38, %c0_39] : memref<1x64x288xf32, #tpu.memory_space<vmem>>, vector<1x64x288xf32>
    %37 = vector.shape_cast %36 : vector<1x64x288xf32> to vector<64x288xf32>
    %38 = vector.shape_cast %35 : vector<64x288xf32> to vector<1x64x288xf32>
    tpu.vector_store %arg4[%c0_37, %c0_38, %c0_39], %38 {strides = array<i32>} : memref<1x64x288xf32, #tpu.memory_space<vmem>>, vector<1x64x288xf32>,
    %c0_40 = arith.constant 0 : index
    %c0_41 = arith.constant 0 : index
    %c18 = arith.constant 18 : index
    %39 = vector.load %arg1[%c0_40, %c0_41, %c18] : memref<1x16x342xbf16, #tpu.memory_space<vmem>>, vector<1x16x288xbf16>
    %40 = vector.shape_cast %39 : vector<1x16x288xbf16> to vector<16x288xbf16>
    %c0_42 = arith.constant 0 : index
    %c0_43 = arith.constant 0 : index
    %c0_44 = arith.constant 0 : index
    %41 = vector.load %arg4[%c0_42, %c0_43, %c0_44] : memref<1x64x288xf32, #tpu.memory_space<vmem>>, vector<1x64x288xf32>
    %42 = vector.shape_cast %41 : vector<1x64x288xf32> to vector<64x288xf32>
    %c3 = arith.constant 3 : index
    %c0_45 = arith.constant 0 : index
    %c0_46 = arith.constant 0 : index
    %43 = vector.load %arg2[%c3, %c0_45, %c0_46] : memref<9x64x16xbf16, #tpu.memory_space<vmem>>, vector<1x64x16xbf16>
    %44 = vector.shape_cast %43 : vector<1x64x16xbf16> to vector<64x16xbf16>
    %cst_47 = arith.constant dense<0.000000e+00> : vector<64x288xf32>
    %45 = tpu.matmul %44, %40, %cst_47 {dimension_numbers = #tpu.dot_dimension_numbers<[1], [0], [0], [1], [0, 0, 1, 1], [], []>} : vector<64x16xbf16>, vector<16x288xbf16>, vector<64x288xf32> -> vector<64x288xf32>
    %46 = arith.addf %42, %45 : vector<64x288xf32>
    %c0_48 = arith.constant 0 : index
    %c0_49 = arith.constant 0 : index
    %c0_50 = arith.constant 0 : index
    %47 = vector.load %arg4[%c0_48, %c0_49, %c0_50] : memref<1x64x288xf32, #tpu.memory_space<vmem>>, vector<1x64x288xf32>
    %48 = vector.shape_cast %47 : vector<1x64x288xf32> to vector<64x288xf32>
    %49 = vector.shape_cast %46 : vector<64x288xf32> to vector<1x64x288xf32>
    tpu.vector_store %arg4[%c0_48, %c0_49, %c0_50], %49 {strides = array<i32>} : memref<1x64x288xf32, #tpu.memory_space<vmem>>, vector<1x64x288xf32>,
    %c0_51 = arith.constant 0 : index
    %c0_52 = arith.constant 0 : index
    %c19 = arith.constant 19 : index
    %50 = vector.load %arg1[%c0_51, %c0_52, %c19] : memref<1x16x342xbf16, #tpu.memory_space<vmem>>, vector<1x16x288xbf16>
    %51 = vector.shape_cast %50 : vector<1x16x288xbf16> to vector<16x288xbf16>
    %c0_53 = arith.constant 0 : index
    %c0_54 = arith.constant 0 : index
    %c0_55 = arith.constant 0 : index
    %52 = vector.load %arg4[%c0_53, %c0_54, %c0_55] : memref<1x64x288xf32, #tpu.memory_space<vmem>>, vector<1x64x288xf32>
    %53 = vector.shape_cast %52 : vector<1x64x288xf32> to vector<64x288xf32>
    %c4 = arith.constant 4 : index
    %c0_56 = arith.constant 0 : index
    %c0_57 = arith.constant 0 : index
    %54 = vector.load %arg2[%c4, %c0_56, %c0_57] : memref<9x64x16xbf16, #tpu.memory_space<vmem>>, vector<1x64x16xbf16>
    %55 = vector.shape_cast %54 : vector<1x64x16xbf16> to vector<64x16xbf16>
    %cst_58 = arith.constant dense<0.000000e+00> : vector<64x288xf32>
    %56 = tpu.matmul %55, %51, %cst_58 {dimension_numbers = #tpu.dot_dimension_numbers<[1], [0], [0], [1], [0, 0, 1, 1], [], []>} : vector<64x16xbf16>, vector<16x288xbf16>, vector<64x288xf32> -> vector<64x288xf32>
    %57 = arith.addf %53, %56 : vector<64x288xf32>
    %c0_59 = arith.constant 0 : index
    %c0_60 = arith.constant 0 : index
    %c0_61 = arith.constant 0 : index
    %58 = vector.load %arg4[%c0_59, %c0_60, %c0_61] : memref<1x64x288xf32, #tpu.memory_space<vmem>>, vector<1x64x288xf32>
    %59 = vector.shape_cast %58 : vector<1x64x288xf32> to vector<64x288xf32>
    %60 = vector.shape_cast %57 : vector<64x288xf32> to vector<1x64x288xf32>
    tpu.vector_store %arg4[%c0_59, %c0_60, %c0_61], %60 {strides = array<i32>} : memref<1x64x288xf32, #tpu.memory_space<vmem>>, vector<1x64x288xf32>,
    %c0_62 = arith.constant 0 : index
    %c0_63 = arith.constant 0 : index
    %c20 = arith.constant 20 : index
    %61 = vector.load %arg1[%c0_62, %c0_63, %c20] : memref<1x16x342xbf16, #tpu.memory_space<vmem>>, vector<1x16x288xbf16>
    %62 = vector.shape_cast %61 : vector<1x16x288xbf16> to vector<16x288xbf16>
    %c0_64 = arith.constant 0 : index
    %c0_65 = arith.constant 0 : index
    %c0_66 = arith.constant 0 : index
    %63 = vector.load %arg4[%c0_64, %c0_65, %c0_66] : memref<1x64x288xf32, #tpu.memory_space<vmem>>, vector<1x64x288xf32>
    %64 = vector.shape_cast %63 : vector<1x64x288xf32> to vector<64x288xf32>
    %c5 = arith.constant 5 : index
    %c0_67 = arith.constant 0 : index
    %c0_68 = arith.constant 0 : index
    %65 = vector.load %arg2[%c5, %c0_67, %c0_68] : memref<9x64x16xbf16, #tpu.memory_space<vmem>>, vector<1x64x16xbf16>
    %66 = vector.shape_cast %65 : vector<1x64x16xbf16> to vector<64x16xbf16>
    %cst_69 = arith.constant dense<0.000000e+00> : vector<64x288xf32>
    %67 = tpu.matmul %66, %62, %cst_69 {dimension_numbers = #tpu.dot_dimension_numbers<[1], [0], [0], [1], [0, 0, 1, 1], [], []>} : vector<64x16xbf16>, vector<16x288xbf16>, vector<64x288xf32> -> vector<64x288xf32>
    %68 = arith.addf %64, %67 : vector<64x288xf32>
    %c0_70 = arith.constant 0 : index
    %c0_71 = arith.constant 0 : index
    %c0_72 = arith.constant 0 : index
    %69 = vector.load %arg4[%c0_70, %c0_71, %c0_72] : memref<1x64x288xf32, #tpu.memory_space<vmem>>, vector<1x64x288xf32>
    %70 = vector.shape_cast %69 : vector<1x64x288xf32> to vector<64x288xf32>
    %71 = vector.shape_cast %68 : vector<64x288xf32> to vector<1x64x288xf32>
    tpu.vector_store %arg4[%c0_70, %c0_71, %c0_72], %71 {strides = array<i32>} : memref<1x64x288xf32, #tpu.memory_space<vmem>>, vector<1x64x288xf32>,
    %c0_73 = arith.constant 0 : index
    %c0_74 = arith.constant 0 : index
    %c36 = arith.constant 36 : index
    %72 = vector.load %arg1[%c0_73, %c0_74, %c36] : memref<1x16x342xbf16, #tpu.memory_space<vmem>>, vector<1x16x288xbf16>
    %73 = vector.shape_cast %72 : vector<1x16x288xbf16> to vector<16x288xbf16>
    %c0_75 = arith.constant 0 : index
    %c0_76 = arith.constant 0 : index
    %c0_77 = arith.constant 0 : index
    %74 = vector.load %arg4[%c0_75, %c0_76, %c0_77] : memref<1x64x288xf32, #tpu.memory_space<vmem>>, vector<1x64x288xf32>
    %75 = vector.shape_cast %74 : vector<1x64x288xf32> to vector<64x288xf32>
    %c6 = arith.constant 6 : index
    %c0_78 = arith.constant 0 : index
    %c0_79 = arith.constant 0 : index
    %76 = vector.load %arg2[%c6, %c0_78, %c0_79] : memref<9x64x16xbf16, #tpu.memory_space<vmem>>, vector<1x64x16xbf16>
    %77 = vector.shape_cast %76 : vector<1x64x16xbf16> to vector<64x16xbf16>
    %cst_80 = arith.constant dense<0.000000e+00> : vector<64x288xf32>
    %78 = tpu.matmul %77, %73, %cst_80 {dimension_numbers = #tpu.dot_dimension_numbers<[1], [0], [0], [1], [0, 0, 1, 1], [], []>} : vector<64x16xbf16>, vector<16x288xbf16>, vector<64x288xf32> -> vector<64x288xf32>
    %79 = arith.addf %75, %78 : vector<64x288xf32>
    %c0_81 = arith.constant 0 : index
    %c0_82 = arith.constant 0 : index
    %c0_83 = arith.constant 0 : index
    %80 = vector.load %arg4[%c0_81, %c0_82, %c0_83] : memref<1x64x288xf32, #tpu.memory_space<vmem>>, vector<1x64x288xf32>
    %81 = vector.shape_cast %80 : vector<1x64x288xf32> to vector<64x288xf32>
    %82 = vector.shape_cast %79 : vector<64x288xf32> to vector<1x64x288xf32>
    tpu.vector_store %arg4[%c0_81, %c0_82, %c0_83], %82 {strides = array<i32>} : memref<1x64x288xf32, #tpu.memory_space<vmem>>, vector<1x64x288xf32>,
    %c0_84 = arith.constant 0 : index
    %c0_85 = arith.constant 0 : index
    %c37 = arith.constant 37 : index
    %83 = vector.load %arg1[%c0_84, %c0_85, %c37] : memref<1x16x342xbf16, #tpu.memory_space<vmem>>, vector<1x16x288xbf16>
    %84 = vector.shape_cast %83 : vector<1x16x288xbf16> to vector<16x288xbf16>
    %c0_86 = arith.constant 0 : index
    %c0_87 = arith.constant 0 : index
    %c0_88 = arith.constant 0 : index
    %85 = vector.load %arg4[%c0_86, %c0_87, %c0_88] : memref<1x64x288xf32, #tpu.memory_space<vmem>>, vector<1x64x288xf32>
    %86 = vector.shape_cast %85 : vector<1x64x288xf32> to vector<64x288xf32>
    %c7 = arith.constant 7 : index
    %c0_89 = arith.constant 0 : index
    %c0_90 = arith.constant 0 : index
    %87 = vector.load %arg2[%c7, %c0_89, %c0_90] : memref<9x64x16xbf16, #tpu.memory_space<vmem>>, vector<1x64x16xbf16>
    %88 = vector.shape_cast %87 : vector<1x64x16xbf16> to vector<64x16xbf16>
    %cst_91 = arith.constant dense<0.000000e+00> : vector<64x288xf32>
    %89 = tpu.matmul %88, %84, %cst_91 {dimension_numbers = #tpu.dot_dimension_numbers<[1], [0], [0], [1], [0, 0, 1, 1], [], []>} : vector<64x16xbf16>, vector<16x288xbf16>, vector<64x288xf32> -> vector<64x288xf32>
    %90 = arith.addf %86, %89 : vector<64x288xf32>
    %c0_92 = arith.constant 0 : index
    %c0_93 = arith.constant 0 : index
    %c0_94 = arith.constant 0 : index
    %91 = vector.load %arg4[%c0_92, %c0_93, %c0_94] : memref<1x64x288xf32, #tpu.memory_space<vmem>>, vector<1x64x288xf32>
    %92 = vector.shape_cast %91 : vector<1x64x288xf32> to vector<64x288xf32>
    %93 = vector.shape_cast %90 : vector<64x288xf32> to vector<1x64x288xf32>
    tpu.vector_store %arg4[%c0_92, %c0_93, %c0_94], %93 {strides = array<i32>} : memref<1x64x288xf32, #tpu.memory_space<vmem>>, vector<1x64x288xf32>,
    %c0_95 = arith.constant 0 : index
    %c0_96 = arith.constant 0 : index
    %c38 = arith.constant 38 : index
    %94 = vector.load %arg1[%c0_95, %c0_96, %c38] : memref<1x16x342xbf16, #tpu.memory_space<vmem>>, vector<1x16x288xbf16>
    %95 = vector.shape_cast %94 : vector<1x16x288xbf16> to vector<16x288xbf16>
    %c0_97 = arith.constant 0 : index
    %c0_98 = arith.constant 0 : index
    %c0_99 = arith.constant 0 : index
    %96 = vector.load %arg4[%c0_97, %c0_98, %c0_99] : memref<1x64x288xf32, #tpu.memory_space<vmem>>, vector<1x64x288xf32>
    %97 = vector.shape_cast %96 : vector<1x64x288xf32> to vector<64x288xf32>
    %c8 = arith.constant 8 : index
    %c0_100 = arith.constant 0 : index
    %c0_101 = arith.constant 0 : index
    %98 = vector.load %arg2[%c8, %c0_100, %c0_101] : memref<9x64x16xbf16, #tpu.memory_space<vmem>>, vector<1x64x16xbf16>
    %99 = vector.shape_cast %98 : vector<1x64x16xbf16> to vector<64x16xbf16>
    %cst_102 = arith.constant dense<0.000000e+00> : vector<64x288xf32>
    %100 = tpu.matmul %99, %95, %cst_102 {dimension_numbers = #tpu.dot_dimension_numbers<[1], [0], [0], [1], [0, 0, 1, 1], [], []>} : vector<64x16xbf16>, vector<16x288xbf16>, vector<64x288xf32> -> vector<64x288xf32>
    %101 = arith.addf %97, %100 : vector<64x288xf32>
    %c0_103 = arith.constant 0 : index
    %c0_104 = arith.constant 0 : index
    %c0_105 = arith.constant 0 : index
    %102 = vector.load %arg4[%c0_103, %c0_104, %c0_105] : memref<1x64x288xf32, #tpu.memory_space<vmem>>, vector<1x64x288xf32>
    %103 = vector.shape_cast %102 : vector<1x64x288xf32> to vector<64x288xf32>
    %104 = vector.shape_cast %101 : vector<64x288xf32> to vector<1x64x288xf32>
    tpu.vector_store %arg4[%c0_103, %c0_104, %c0_105], %104 {strides = array<i32>} : memref<1x64x288xf32, #tpu.memory_space<vmem>>, vector<1x64x288xf32>,
    return
  }
  func.func @transform_0(%arg0: i32) -> (i32, i32, i32) {
    %c0_i32 = arith.constant 0 : i32
    %c0_i32_0 = arith.constant 0 : i32
    %c0_i32_1 = arith.constant 0 : i32
    return %arg0, %c0_i32, %c0_i32_0 : i32, i32, i32
  }
  func.func @transform_1(%arg0: i32) -> (i32, i32, i32) {
    %c0_i32 = arith.constant 0 : i32
    %c0_i32_0 = arith.constant 0 : i32
    %c0_i32_1 = arith.constant 0 : i32
    %c0_i32_2 = arith.constant 0 : i32
    return %c0_i32, %c0_i32_0, %c0_i32_1 : i32, i32, i32
  }
  func.func @transform_2(%arg0: i32) -> (i32, i32) {
    %c0_i32 = arith.constant 0 : i32
    %c0_i32_0 = arith.constant 0 : i32
    %c0_i32_1 = arith.constant 0 : i32
    return %c0_i32, %c0_i32_0 : i32, i32
  }
  func.func @transform_3(%arg0: i32) -> (i32, i32, i32) {
    %c0_i32 = arith.constant 0 : i32
    %c0_i32_0 = arith.constant 0 : i32
    %c0_i32_1 = arith.constant 0 : i32
    return %arg0, %c0_i32, %c0_i32_0 : i32, i32, i32
  }
}

</mosaic_0001>

<bundles_post_ra>
// kernel: tpu_custom_call.1
= control target key start
LH: loop header
LB: loop body
LE: loop exit
PB: predicated region body
PF: predicated region fallthrough
CT: control target
= control target key end

     0   :  { %8 = vsyncpa [#allocation3], 0  ;;  %s4328_s0 = inlined_call_operand.vmem [shape: bf16[2,16,342], index: 0, kind: input, shape index: {}]   ;;  %s4329_s1 = inlined_call_operand.vmem [shape: bf16[9,64,16], index: 1, kind: input, shape index: {}]   ;;  %s4330_s2 = inlined_call_operand.vmem [shape: f32[64,1], index: 2, kind: input, shape index: {}]   ;;  %s4331_s3 = inlined_call_operand.hbm [shape: f32[2,64,288], index: 3, kind: output, shape index: {}]  }
   0x1   :  { %10 = vsyncpa [#allocation3 + $0x1], 0  ;;  %s3371_s12 = smov 0   ;;  %s3373_s13 = smov 0  }
   0x2   :  { %s3375_s14 = smov 0   ;;  %s3377_s15 = smov 0  }
   0x3 LB: > { %s3392_s16 = sadd.s32 4294967295, %s3337_s15   ;;  %s2830_s17 = sadd.s32 4294967294, %s3337_s15   ;;  %s3337_s15 = sphi %s3377_s15, %s4343_s15   ;;  %s3333_s14 = sphi %s3375_s14, %s4342_s14   ;;  %s3329_s13 = sphi %s3373_s13, %s4341_s13   ;;  %s3325_s12 = sphi %s3371_s12, %s4340_s12  }
   0x4   : > { %s3396_s18 = sadd.s32 1, %s3337_s15   ;;  %s91_s19 = sadd.s32 1, %s3333_s14 }
   0x5   : > { %s88_s20 = ssub.s32 %s3337_s15, %s3396_s18  ;;  %p101_p0 = scmp.ne.s32.totalorder %s3333_s14, %s3329_s13 }
   0x6   : > { %p89_p1 = scmp.eq.s32.totalorder %s88_s20, 0  ;;  %p102_p2 = scmp.eq.s32.totalorder %s3392_s16, 1 }
   0x7   : > { %p107_p3 = scmp.ne.s32.totalorder %s3329_s13, %s3325_s12  ;;  %p108_p4 = scmp.eq.s32.totalorder %s2830_s17, 1 }
   0x8   : > { %s3407_s21 = scalar_select %p89_p1, %s3333_s14, %s91_s19  }
   0x9   : > { %p3409_p5 = por %p102_p2, %p101_p0  ;;  %p3413_p6 = por %p108_p4, %p107_p3 }
   0xa   : > { %p2833_p7 = scmp.ge.s32.totalorder %s3337_s15, 1  ;;  %p140_p8 = scmp.lt.s32.totalorder %s3337_s15, 3 }
   0xc   : > { %p141_p9 = pnand %p2833_p7, %p140_p8 }
   0xe   : > { %144 = sbr.rel (%p141_p9) target bundleno = 550 (0x226), region = 32 }
  0x13   : > { %p164_p10 = scmp.lt.s32.totalorder %s3392_s16, 1  ;;  %v3339_v0 = vmov 0   ;;  %s3340_s29 = smov 127   ;;  %v3237_v4 = vld [vmem:[%s4329_s1] sm:$0xff]   ;;  %vm315_vm0 = vcmask 130048   ;;  %v3238_v5 = vld [vmem:[%s4329_s1 + $0x18] sm:$0xff]  }
  0x14   : > { %360 = vmatprep.mubr.bf16.mxu0 %v3339_v0  ;;  %390 = vmatprep.mubr.bf16.mxu1 %v3339_v0  ;;  %s3341_s7 = smov 126   ;;  %v3240_v8 = vld [vmem:[%s4329_s1 + $0x8] sm:$0xff]   ;;  %v3242_v10 = vld [vmem:[%s4329_s1 + $0x10] sm:$0xff]   ;;  %s3342_s17 = smov 110   ;;  %v3474_v12 = vld [vmem:[%s4329_s1 + $0x20] sm:$0xff]   ;;  %vm590_vm1 = vcmask 1039360  }
  0x15   : > { %s165_s24 = scalar_select %p164_p10, %s3392_s16, 1  ;;  %3228 = vset.pattern.permute.xlu1 %v3339_v0  ;;  %3227 = vset.pattern.permute.xlu0 %v3339_v0  ;;  %v170_v17 = vld [vmem:[%s4330_s2] sm:$0xff]  ;;  %v171_v18 = vld [vmem:[%s4330_s2 + $0x8] sm:$0xff]  ;;  %v173_v19 = vld [vmem:[%s4330_s2 + $0x18] sm:$0xff]  ;;  %vm870_vm2 = vcmask 1031168   ;;  %vm1150_vm3 = vcmask 900096  }
  0x16   : > { %s3345_s26 = smov 92   ;;  %s3346_s27 = smov 91   ;;  %v172_v20 = vld [vmem:[%s4330_s2 + $0x10] sm:$0xff]  ;;  %v175_v21 = vld [vmem:[%s4330_s2 + $0x28] sm:$0xff]  ;;  %v174_v22 = vld [vmem:[%s4330_s2 + $0x20] sm:$0xff]  ;;  %vm1430_vm4 = vcmask 891904  }
  0x17   : > { %s3175_s25 = smul.u32 24, %s165_s24  ;;  %s3343_s24 = smov 109   ;;  %v177_v23 = vld [vmem:[%s4330_s2 + $0x38] sm:$0xff]  ;;  %v176_v24 = vld [vmem:[%s4330_s2 + $0x30] sm:$0xff]  ;;  %v3244_v29 = vld [vmem:[%s4329_s1 + $0x28] sm:$0xff]   ;;  %vm2270_vm5 = vcmask 744448  }
  0x18   : > { %v3245_v32 = vld [vmem:[%s4329_s1 + $0x30] sm:$0xff]   ;;  %v3246_v38 = vld [vmem:[%s4329_s1 + $0x38] sm:$0xff]   ;;  %v3248_v44 = vld [vmem:[%s4329_s1 + $0x40] sm:$0xff]   ;;  %vm2550_vm6 = vcmask 736256   ;;  %vm1710_vm7 = vcmask 883712   ;;  %vm220_vm8 = vcmask 261120  }
  0x19   : > { %s3428_s28 = scalar_lea.vmem %s4328_s0, %s3175_s25  ;;  %s3344_s25 = smov 108   ;;  %v3249_v50 = vld [vmem:[%s4329_s1 + $0x48] sm:$0xff]   ;;  %v3250_v55 = vld [vmem:[%s4329_s1 + $0x50] sm:$0xff]   ;;  %v3252_v61 = vld [vmem:[%s4329_s1 + $0x58] sm:$0xff]   ;;  %vm1990_vm9 = vcmask 752640  }
  0x1a   : > { %v3431_v1 = vld [vmem:[%s3428_s28 + $0x4] ss:$12 sps:$4 sm:$0xff]   ;;  %v3434_v2 = vld [vmem:[%s3428_s28] ss:$12 sps:$4 sm:$0xff]   ;;  %v3232_v3 = vld [vmem:[%s3428_s28 + $0x8] ss:$12 sps:$4 sm:$0xff]  }
  0x1b   : > { %586 = vrot.lane.b32.xlu0 %v3431_v1, %s3340_s29  ;;  %342 = vmatprep.subr.bf16.mxu0 %v3431_v1  ;;  %v3233_v6 = vld [vmem:[%s3428_s28 + $0x8] ss:$12 sps:$4 sm:$0xff]   ;;  %v3253_v63 = vld [vmem:[%s4329_s1 + $0x60] sm:$0xff]   ;;  %s3348_s6 = smov [#allocation2]  }
  0x1c   : > { %584 = vrot.lane.b32.xlu1 %v3434_v2, %s3340_s29  ;;  %3172 = vmatprep.subr.bf16.mxu1 %v3431_v1  ;;  %v3239_v7 = vld [vmem:[%s3428_s28 + $0x8] ss:$12 sps:$4 sm:$0xff]  }
  0x1d   : > { %343 = vmatpush1.bf16.msra.mxu0 %v3434_v2  ;;  %3173 = vmatpush1.bf16.msra.mxu1 %v3434_v2  ;;  %v3234_v9 = vld [vmem:[%s3428_s28 + $0x8] ss:$12 sps:$4 sm:$0xff]  }
  0x1e   : > { %3082 = vmatprep.subr.bf16.mxu1 %v3239_v7  ;;  %v3235_v11 = vld [vmem:[%s3428_s28 + $0x8] ss:$12 sps:$4 sm:$0xff]  }
  0x1f   : > { %588 = vrot.lane.b32.xlu0 %v3232_v3, %s3340_s29  ;;  %v3236_v13 = vld [vmem:[%s3428_s28 + $0x8] ss:$12 sps:$4 sm:$0xff]   ;;  %s3347_s29 = smov 90  }
  0x20   : > { %866 = vrot.lane.b32.xlu1 %v3431_v1, %s3341_s7  ;;  %2842 = vmatmul.mubr.msk.bf16.vlgmr.msra.gmra.mxu0 %vm315_vm0, %v3237_v4  ;;  %v3241_v14 = vld [vmem:[%s3428_s28 + $0x8] ss:$12 sps:$4 sm:$0xff]  }
  0x21   : > { %2845 = vmatmul.mubr.msk.bf16.vlgmr.msra.gmra.mxu1 %vm315_vm0, %v3238_v5  ;;  %370 = vmatprep.mubr.bf16.mxu0 %v3339_v0  ;;  %v3247_v15 = vld [vmem:[%s3428_s28 + $0x8] ss:$12 sps:$4 sm:$0xff]  }
  0x22   : > { %3084 = vmatprep.mubr.msk.bf16.mxu1 %vm315_vm0, %v3237_v4  ;;  %3083 = vmatpush3.bf16.msra.mxu1 %v3239_v7  ;;  %v3251_v16 = vld [vmem:[%s3428_s28 + $0x8] ss:$12 sps:$4 sm:$0xff]  }
  0x23   : > { %868 = vrot.lane.b32.xlu0 %v3233_v6, %s3341_s7  ;;  %v3255_v4 = vld [vmem:[%s4329_s1 + $0x70] sm:$0xff]  }
  0x24   : > { %864 = vrot.lane.b32.xlu1 %v3434_v2, %s3341_s7  ;;  %s3281_s7 = sshll.u32 %s3348_s6, 4  ;;  %s3282_s7 = int_to_ptr.vmem [resolvable:$false] %s3281_s7 }
  0x25   : > { %s3283_s8 = scalar_lea.vmem %s3282_s7, 6144 }
  0x27   : > { %1146 = vrot.lane.b32.xlu0 %v3431_v1, %s3342_s17 }
  0x28   : > { %1148 = vrot.lane.b32.xlu1 %v3234_v9, %s3342_s17  ;;  %2843 = vmatmul.mubr.msk.bf16.gmra.mxu0 %vm315_vm0, %v3240_v8  ;;  %v3256_v9 = vld [vmem:[%s4329_s1 + $0x78] sm:$0xff]  }
  0x29   : > { %3085 = vmatmul.mubr.msk.bf16.vlgmr.msra.gmra.mxu1 %vm315_vm0, %v3240_v8  ;;  %380 = vmatprep.mubr.bf16.mxu0 %v3339_v0 }
  0x2a   : > { %3088 = vmatprep.mubr.msk.bf16.mxu1 %vm315_vm0, %v3242_v10 }
  0x2b   : > { %1144 = vrot.lane.b32.xlu0 %v3434_v2, %s3342_s17 }
  0x2c   : > { %1426 = vrot.lane.b32.xlu1 %v3431_v1, %s3343_s24 }
  0x2f   : > { %1428 = vrot.lane.b32.xlu0 %v3235_v11, %s3343_s24 }
  0x30   : > { %1424 = vrot.lane.b32.xlu1 %v3434_v2, %s3343_s24  ;;  %2844 = vmatmul.mubr.msk.bf16.gmra.mxu0 %vm315_vm0, %v3242_v10  ;;  %s3176_s24 = smul.u32 3072, %s3392_s16 }
  0x31   : > { %3089 = vmatmul.mubr.msk.bf16.gmra.mxu1 %vm315_vm0, %v3238_v5  ;;  %3094 = vmatprep.mubr.msk.bf16.mxu0 %vm315_vm0, %v3474_v12 }
  0x32   : > { %640 = vmatprep.mubr.bf16.mxu1 %v3339_v0 }
  0x33   : > { %1706 = vrot.lane.b32.xlu0 %v3431_v1, %s3344_s25 }
  0x34   : > { %1708 = vrot.lane.b32.xlu1 %v3236_v13, %s3344_s25 }
  0x37   : > { %1704 = vrot.lane.b32.xlu0 %v3434_v2, %s3344_s25  ;;  %s161_s25 = sand.u32 1, %s3329_s13  }
  0x38   : > { %1986 = vrot.lane.b32.xlu1 %v3431_v1, %s3345_s26  ;;  %s4288_s30 = scalar_lea.sflag [#allocation3], %s161_s25 }
  0x3b   : > { %1988 = vrot.lane.b32.xlu0 %v3241_v14, %s3345_s26  ;;  %v3257_v14 = vld [vmem:[%s4329_s1 + $0x80] sm:$0xff]  }
  0x3c   : > { %1984 = vrot.lane.b32.xlu1 %v3434_v2, %s3345_s26  ;;  %s3174_s26 = smul.u32 192, %s161_s25 }
  0x3e   : > { %s3619_s5 = scalar_lea.vmem [#allocation2], %s3174_s26 }
  0x3f   : > { %2266 = vrot.lane.b32.xlu0 %v3431_v1, %s3346_s27  ;;  %s2768_s26 = sshll.u32 %s3619_s5, 4  ;;  %s4279_s26 = int_to_ptr.vmem [resolvable:$true] %s2768_s26 }
  0x40   : > { %2268 = vrot.lane.b32.xlu1 %v3247_v15, %s3346_s27  ;;  %s3277_s4 = scalar_lea.vmem %s4279_s26, 3072  ;;  %p3284_p0 = scmp.lt.s32.totalorder %s4279_s26, %s3282_s7 }
  0x41   : > { %p3278_p11 = scmp.ne.s32.totalorder %s4279_s26, %s3277_s4  ;;  %p3285_p1 = scmp.lt.s32.totalorder %s3283_s8, %s3277_s4 }
  0x43   : > { %2264 = vrot.lane.b32.xlu0 %v3434_v2, %s3346_s27  ;;  %p3279_p12 = pnand %p3278_p11, %p3409_p5  ;;  %p3286_p2 = por %p3285_p1, %p3284_p0 }
  0x44   : > { %2546 = vrot.lane.b32.xlu1 %v3431_v1, %s3347_s29 }
  0x45   : > { %p3280_p13 = pneg %p3279_p12 }
  0x47   : > { %2548 = vrot.lane.b32.xlu0 %v3251_v16, %s3347_s29  ;;  %p3287_p3 = pnand %p3286_p2, %p3280_p13 }
  0x48   : > { %2544 = vrot.lane.b32.xlu1 %v3434_v2, %s3347_s29  ;;  %v3254_v2 = vld [vmem:[%s4329_s1 + $0x68] sm:$0xff]   ;;  %s4277_s29 = scalar_lea.hbm %s4331_s3, %s3176_s24 }
  0x4b   : > { %180 = vperm.xlu0 %3227, %v170_v17  }
  0x4c   : > { %185 = vperm.xlu1 %3228, %v171_v18   ;;  %v3258_v18 = vld [vmem:[%s4329_s1 + $0x88] sm:$0xff]  }
  0x4f   : > { %195 = vperm.xlu0 %3227, %v173_v19  }
  0x50   : > { %190 = vperm.xlu1 %3228, %v172_v20  }
  0x53   : > { %205 = vperm.xlu0 %3227, %v175_v21  }
  0x54   : > { %200 = vperm.xlu1 %3228, %v174_v22   ;;  %v3259_v22 = vld [vmem:[%s4329_s1 + $0x90] sm:$0xff]  }
  0x57   : > { %215 = vperm.xlu0 %3227, %v177_v23  }
  0x58   : > { %210 = vperm.xlu1 %3228, %v176_v24  }
  0x8d   : > { %v587_v25 = vpop.permute.xlu0 %586 }
  0x8e   : > { %v585_v26 = vpop.permute.xlu1 %584 }
  0x8f   : > { %v591_v31 = vsel %vm590_vm1, %v585_v26, %v587_v25 }
  0x91   : > { %v589_v27 = vpop.permute.xlu0 %588 }
  0x92   : > { %3092 = vmatprep.subr.bf16.mxu0 %v589_v27  ;;  %v592_v28 = vsel %vm590_vm1, %v587_v25, %v589_v27  ;;  %v867_v30 = vpop.permute.xlu1 %866 }
  0x93   : > { %622 = vmatprep.subr.bf16.mxu1 %v592_v28  ;;  %3093 = vmatpush3.bf16.msra.mxu0 %v589_v27 }
  0x94   : > { %623 = vmatpush1.bf16.msra.mxu1 %v591_v31 }
  0x95   : > { %v869_v33 = vpop.permute.xlu0 %868 }
  0x96   : > { %3095 = vmatmul.mubr.msk.bf16.vlgmr.msra.gmra.mxu0 %vm315_vm0, %v3244_v29  ;;  %v865_v34 = vpop.permute.xlu1 %864  ;;  %v872_v35 = vsel %vm870_vm2, %v867_v30, %v869_v33  ;;  %3102 = vmatprep.subr.bf16.mxu1 %v869_v33 }
  0x97   : > { %2865 = vmatmul.mubr.msk.bf16.vlgmr.msra.gmra.mxu1 %vm315_vm0, %v3474_v12  ;;  %3098 = vmatprep.mubr.msk.bf16.mxu0 %vm315_vm0, %v3245_v32  ;;  %v871_v36 = vsel %vm870_vm2, %v865_v34, %v867_v30 }
  0x98   : > { %650 = vmatprep.mubr.bf16.mxu1 %v3339_v0  ;;  %902 = vmatprep.subr.bf16.mxu0 %v872_v35 }
  0x99   : > { %903 = vmatpush1.bf16.msra.mxu0 %v871_v36  ;;  %3103 = vmatpush3.bf16.msra.mxu1 %v869_v33  ;;  %v1147_v37 = vpop.permute.xlu0 %1146 }
  0x9a   : > { %v1149_v39 = vpop.permute.xlu1 %1148 }
  0x9b   : > { %3112 = vmatprep.subr.bf16.mxu0 %v1149_v39  ;;  %v1152_v40 = vsel %vm1150_vm3, %v1147_v37, %v1149_v39 }
  0x9c   : > { %1182 = vmatprep.subr.bf16.mxu1 %v1152_v40 }
  0x9d   : > { %v1145_v41 = vpop.permute.xlu0 %1144 }
  0x9e   : > { %3099 = vmatmul.mubr.msk.bf16.gmra.mxu0 %vm315_vm0, %v3246_v38  ;;  %v1427_v42 = vpop.permute.xlu1 %1426  ;;  %v1151_v57 = vsel %vm1150_vm3, %v1145_v41, %v1147_v37 }
  0x9f   : > { %2866 = vmatmul.mubr.msk.bf16.gmra.mxu1 %vm315_vm0, %v3244_v29  ;;  %920 = vmatprep.mubr.bf16.mxu0 %v3339_v0 }
  0xa0   : > { %660 = vmatprep.mubr.bf16.mxu1 %v3339_v0 }
  0xa1   : > { %v3538_v43 = vpop.permute.xlu0 %1428 }
  0xa2   : > { %v1425_v45 = vpop.permute.xlu1 %1424  ;;  %v1432_v47 = vsel %vm1430_vm4, %v1427_v42, %v3538_v43 }
  0xa3   : > { %v1431_v5 = vsel %vm1430_vm4, %v1425_v45, %v1427_v42  ;;  %v3260_v42 = vld [vmem:[%s4329_s1 + $0x98] sm:$0xff]   ;;  %v3261_v45 = vld [vmem:[%s4329_s1 + $0xa0] sm:$0xff]  }
  0xa5   : > { %v3543_v46 = vpop.permute.xlu0 %1706 }
  0xa6   : > { %2888 = vmatmul.mubr.msk.bf16.vlgmr.msra.gmra.mxu0 %vm315_vm0, %v3248_v44  ;;  %v3548_v48 = vpop.permute.xlu1 %1708 }
  0xa7   : > { %2867 = vmatmul.mubr.msk.bf16.gmra.mxu1 %vm315_vm0, %v3245_v32  ;;  %930 = vmatprep.mubr.bf16.mxu0 %v3339_v0  ;;  %v1712_v7 = vsel %vm1710_vm7, %v3543_v46, %v3548_v48 }
  0xa8   : > { %670 = vmatprep.mubr.bf16.mxu1 %v3339_v0  ;;  %3113 = vmatpush3.bf16.msra.mxu0 %v1149_v39 }
  0xa9   : > { %1462 = vmatprep.subr.bf16.mxu0 %v1432_v47  ;;  %v3553_v49 = vpop.permute.xlu0 %1704 }
  0xaa   : > { %v3558_v51 = vpop.permute.xlu1 %1986  ;;  %v1711_v29 = vsel %vm1710_vm7, %v3553_v49, %v3543_v46 }
  0xad   : > { %v3560_v52 = vpop.permute.xlu0 %1988 }
  0xae   : > { %2889 = vmatmul.mubr.msk.bf16.gmra.mxu0 %vm315_vm0, %v3249_v50  ;;  %v3563_v53 = vpop.permute.xlu1 %1984  ;;  %v1992_v17 = vsel %vm1990_vm9, %v3558_v51, %v3560_v52 }
  0xaf   : > { %2868 = vmatmul.mubr.msk.bf16.gmra.mxu1 %vm315_vm0, %v3246_v38  ;;  %940 = vmatprep.mubr.bf16.mxu0 %v3339_v0 }
  0xb0   : > { %3104 = vmatprep.mubr.msk.bf16.mxu1 %vm315_vm0, %v3248_v44 }
  0xb1   : > { %v3568_v54 = vpop.permute.xlu0 %2266 }
  0xb2   : > { %v3573_v56 = vpop.permute.xlu1 %2268 }
  0xb5   : > { %v2265_v58 = vpop.permute.xlu0 %2264 }
  0xb6   : > { %2890 = vmatmul.mubr.msk.bf16.gmra.mxu0 %vm315_vm0, %v3250_v55  ;;  %v3579_v59 = vsel %vm2270_vm5, %v2265_v58, %v3568_v54  ;;  %v3581_v60 = vpop.permute.xlu1 %2546 }
  0xb7   : > { %3105 = vmatmul.mubr.msk.bf16.vlgmr.msra.gmra.mxu1 %vm315_vm0, %v3249_v50  ;;  %950 = vmatprep.mubr.bf16.mxu0 %v3339_v0 }
  0xb8   : > { %3108 = vmatprep.mubr.msk.bf16.mxu1 %vm315_vm0, %v3250_v55  ;;  %1183 = vmatpush1.bf16.msra.mxu1 %v1151_v57 }
  0xb9   : > { %3122 = vmatprep.subr.bf16.mxu1 %v3538_v43  ;;  %v3607_v3 = vpop.permute.xlu0 %2548 }
  0xba   : > { %v2545_v62 = vpop.permute.xlu1 %2544 }
  0xbb   : > { %v3595_v1 = vsel %vm2550_vm6, %v2545_v62, %v3581_v60 }
  0xbe   : > { %2891 = vmatmul.mubr.msk.bf16.gmra.mxu0 %vm315_vm0, %v3252_v61 }
  0xbf   : > { %3109 = vmatmul.mubr.msk.bf16.gmra.mxu1 %vm315_vm0, %v3252_v61  ;;  %3114 = vmatprep.mubr.msk.bf16.mxu0 %vm315_vm0, %v3253_v63 }
  0xc0   : > { %1200 = vmatprep.mubr.bf16.mxu1 %v3339_v0 }
  0xc6   : > { %3115 = vmatmul.mubr.msk.bf16.vlgmr.msra.gmra.mxu0 %vm315_vm0, %v3254_v2  ;;  %v181_v6 = vpop.permute.xlu0 %180 }
  0xc7   : > { %2911 = vmatmul.mubr.msk.bf16.vlgmr.msra.gmra.mxu1 %vm315_vm0, %v3253_v63  ;;  %3118 = vmatprep.mubr.msk.bf16.mxu0 %vm315_vm0, %v3255_v4  ;;  %221 = vst.msk [vmem:[%s3619_s5 + $0x10] sm:$0xff] %vm220_vm8, %v181_v6  ;;  %v186_v8 = vpop.permute.xlu1 %185 }
  0xc8   : > { %1210 = vmatprep.mubr.bf16.mxu1 %v3339_v0  ;;  %1463 = vmatpush1.bf16.msra.mxu0 %v1431_v5  ;;  %224 = vst.msk [vmem:[%s3619_s5 + $0x28] sm:$0xff] %vm220_vm8, %v186_v8 }
  0xc9   : > { %3123 = vmatpush3.bf16.msra.mxu1 %v3538_v43  ;;  %3132 = vmatprep.subr.bf16.mxu0 %v3548_v48 }
  0xca   : > { %1742 = vmatprep.subr.bf16.mxu1 %v1712_v7  ;;  %v3631_v10 = vpop.permute.xlu0 %195 }
  0xcb   : > { %230 = vst.msk [vmem:[%s3619_s5 + $0x58] sm:$0xff] %vm220_vm8, %v3631_v10  ;;  %v191_v11 = vpop.permute.xlu1 %190 }
  0xcc   : > { %227 = vst.msk [vmem:[%s3619_s5 + $0x40] sm:$0xff] %vm220_vm8, %v191_v11 }
  0xce   : > { %3119 = vmatmul.mubr.msk.bf16.gmra.mxu0 %vm315_vm0, %v3256_v9  ;;  %v3639_v12 = vpop.permute.xlu0 %205  ;;  %v249_v41 = vld [vmem:[%s3619_s5 + $0x10] sm:$0xff] }
  0xcf   : > { %2912 = vmatmul.mubr.msk.bf16.gmra.mxu1 %vm315_vm0, %v3254_v2  ;;  %1480 = vmatprep.mubr.bf16.mxu0 %v3339_v0  ;;  %236 = vst.msk [vmem:[%s3619_s5 + $0x88] sm:$0xff] %vm220_vm8, %v3639_v12  ;;  %v3646_v13 = vpop.permute.xlu1 %200  ;;  %v252_v58 = vld [vmem:[%s3619_s5 + $0x28] sm:$0xff] }
  0xd0   : > { %1220 = vmatprep.mubr.bf16.mxu1 %v3339_v0  ;;  %233 = vst.msk [vmem:[%s3619_s5 + $0x70] sm:$0xff] %vm220_vm8, %v3646_v13 }
  0xd2   : > { %v216_v15 = vpop.permute.xlu0 %215 }
  0xd3   : > { %242 = vst.msk [vmem:[%s3619_s5 + $0xb8] sm:$0xff] %vm220_vm8, %v216_v15  ;;  %v211_v16 = vpop.permute.xlu1 %210  ;;  %v255_v36 = vld [vmem:[%s3619_s5 + $0x40] sm:$0xff] }
  0xd4   : > { %239 = vst.msk [vmem:[%s3619_s5 + $0xa0] sm:$0xff] %vm220_vm8, %v211_v16 }
  0xd6   : > { %2934 = vmatmul.mubr.msk.bf16.vlgmr.msra.gmra.mxu0 %vm315_vm0, %v3257_v14 }
  0xd7   : > { %2913 = vmatmul.mubr.msk.bf16.gmra.mxu1 %vm315_vm0, %v3255_v4  ;;  %1490 = vmatprep.mubr.bf16.mxu0 %v3339_v0 }
  0xd8   : > { %1230 = vmatprep.mubr.bf16.mxu1 %v3339_v0  ;;  %3133 = vmatpush3.bf16.msra.mxu0 %v3548_v48  ;;  %v258_v48 = vld [vmem:[%s3619_s5 + $0x58] sm:$0xff] }
  0xd9   : > { %2022 = vmatprep.subr.bf16.mxu0 %v1992_v17 }
  0xdb   : > { %v267_v4 = vld [vmem:[%s3619_s5 + $0xa0] sm:$0xff] }
  0xde   : > { %2935 = vmatmul.mubr.msk.bf16.gmra.mxu0 %vm315_vm0, %v3258_v18 }
  0xdf   : > { %2914 = vmatmul.mubr.msk.bf16.gmra.mxu1 %vm315_vm0, %v3256_v9  ;;  %1500 = vmatprep.mubr.bf16.mxu0 %v3339_v0  ;;  %v261_v9 = vld [vmem:[%s3619_s5 + $0x70] sm:$0xff] }
  0xe0   : > { %3124 = vmatprep.mubr.msk.bf16.mxu1 %vm315_vm0, %v3257_v14  ;;  %v362_v19 = vpop.f32.mrf.mxu0 }
  0xe1   : > { %v3674_v20 = vadd.f32 %v362_v19, %v181_v6  ;;  %v392_v21 = vpop.f32.mrf.mxu1 }
  0xe2   : > { %v364_v23 = vpop.f32.mrf.mxu0  ;;  %v3679_v24 = vadd.f32 %v392_v21, %v211_v16 }
  0xe3   : > { %v3681_v25 = vadd.f32 %v364_v23, %v181_v6  ;;  %v394_v26 = vpop.f32.mrf.mxu1 }
  0xe4   : > { %v366_v27 = vpop.f32.mrf.mxu0  ;;  %v3683_v28 = vadd.f32 %v394_v26, %v211_v16 }
  0xe5   : > { %v3688_v30 = vadd.f32 %v366_v27, %v186_v8  ;;  %v396_v31 = vpop.f32.mrf.mxu1  ;;  %v264_v27 = vld [vmem:[%s3619_s5 + $0x88] sm:$0xff] }
  0xe6   : > { %2936 = vmatmul.mubr.msk.bf16.gmra.mxu0 %vm315_vm0, %v3259_v22  ;;  %v368_v32 = vpop.f32.mrf.mxu0  ;;  %v3691_v33 = vadd.f32 %v396_v31, %v216_v15  ;;  %v3264_v31 = vld [vmem:[%s4329_s1 + $0xb8] sm:$0xff]  }
  0xe7   : > { %3125 = vmatmul.mubr.msk.bf16.vlgmr.msra.gmra.mxu1 %vm315_vm0, %v3258_v18  ;;  %1510 = vmatprep.mubr.bf16.mxu0 %v3339_v0  ;;  %v3695_v34 = vadd.f32 %v368_v32, %v186_v8  ;;  %v398_v35 = vpop.f32.mrf.mxu1  ;;  %v270_v18 = vld [vmem:[%s3619_s5 + $0xb8] sm:$0xff]  ;;  %v3266_v32 = vld [vmem:[%s4329_s1 + $0xc8] sm:$0xff]  }
  0xe8   : > { %3128 = vmatprep.mubr.msk.bf16.mxu1 %vm315_vm0, %v3259_v22  ;;  %1743 = vmatpush1.bf16.msra.mxu1 %v1711_v29  ;;  %v372_v37 = vpop.f32.mrf.mxu0  ;;  %v3699_v38 = vadd.f32 %v398_v35, %v216_v15  ;;  %v3263_v15 = vld [vmem:[%s4329_s1 + $0xb0] sm:$0xff]   ;;  %v1991_v22 = vsel %vm1990_vm9, %v3563_v53, %v3558_v51  ;;  %v2272_v29 = vsel %vm2270_vm5, %v3568_v54, %v3573_v56  ;;  %v3269_v35 = vld [vmem:[%s4329_s1 + $0xe0] sm:$0xff]  }
  0xe9   : > { %3142 = vmatprep.subr.bf16.mxu1 %v3560_v52  ;;  %v3702_v39 = vadd.f32 %v372_v37, %v191_v11  ;;  %v3086_v40 = vpop.f32.mrf.mxu1  ;;  %v2552_v54 = vsel %vm2550_vm6, %v3581_v60, %v3607_v3  ;;  %v3267_v60 = vld [vmem:[%s4329_s1 + $0xd0] sm:$0xff]   ;;  %v3272_v37 = vld [vmem:[%s4329_s1 + $0xf8] sm:$0xff]  }
  0xea   : > { %v474_v43 = vadd.f32 %v3086_v40, %v255_v36  ;;  %v374_v44 = vpop.f32.mrf.mxu0  ;;  %v3271_v36 = vld [vmem:[%s4329_s1 + $0xf0] sm:$0xff]   ;;  %v3273_v40 = vld [vmem:[%s4329_s1 + $0x100] sm:$0xff]  }
  0xeb   : > { %v3711_v46 = vadd.f32 %v374_v44, %v191_v11  ;;  %v435_v47 = vpop.f32.mrf.mxu1 }
  0xec   : > { %498 = vst.msk [vmem:[%s3619_s5 + $0x40] sm:$0xff] %vm220_vm8, %v474_v43  ;;  %v468_v49 = vadd.f32 %v435_v47, %v249_v41  ;;  %v376_v50 = vpop.f32.mrf.mxu0  ;;  %v3276_v41 = vld [vmem:[%s4329_s1 + $0x118] sm:$0xff]  }
  0xed   : > { %v3717_v55 = vadd.f32 %v376_v50, %v3631_v10  ;;  %v3087_v57 = vpop.f32.mrf.mxu1 }
  0xee   : > { %2937 = vmatmul.mubr.msk.bf16.gmra.mxu0 %vm315_vm0, %v3260_v42  ;;  %492 = vst.msk [vmem:[%s3619_s5 + $0x10] sm:$0xff] %vm220_vm8, %v468_v49  ;;  %v477_v61 = vadd.f32 %v3087_v57, %v258_v48  ;;  %v378_v62 = vpop.f32.mrf.mxu0 }
  0xef   : > { %3129 = vmatmul.mubr.msk.bf16.gmra.mxu1 %vm315_vm0, %v3260_v42  ;;  %3134 = vmatprep.mubr.msk.bf16.mxu0 %vm315_vm0, %v3261_v45  ;;  %v3726_v63 = vadd.f32 %v378_v62, %v3631_v10  ;;  %v438_v2 = vpop.f32.mrf.mxu1  ;;  %v3262_v10 = vld [vmem:[%s4329_s1 + $0xa8] sm:$0xff]  }
  0xf0   : > { %1760 = vmatprep.mubr.bf16.mxu1 %v3339_v0  ;;  %501 = vst.msk [vmem:[%s3619_s5 + $0x58] sm:$0xff] %vm220_vm8, %v477_v61  ;;  %v471_v5 = vadd.f32 %v438_v2, %v252_v58  ;;  %v382_v6 = vpop.f32.mrf.mxu0 }
  0xf1   : > { %v3733_v7 = vadd.f32 %v382_v6, %v3646_v13  ;;  %v3090_v8 = vpop.f32.mrf.mxu1 }
  0xf2   : > { %495 = vst.msk [vmem:[%s3619_s5 + $0x28] sm:$0xff] %vm220_vm8, %v471_v5  ;;  %v486_v11 = vadd.f32 %v3090_v8, %v267_v4  ;;  %v384_v14 = vpop.f32.mrf.mxu0 }
  0xf3   : > { %v3745_v16 = vadd.f32 %v384_v14, %v3646_v13  ;;  %v451_v17 = vpop.f32.mrf.mxu1  ;;  %v526_v43 = vld [vmem:[%s3619_s5 + $0x40] sm:$0xff] }
  0xf4   : > { %510 = vst.msk [vmem:[%s3619_s5 + $0xa0] sm:$0xff] %vm220_vm8, %v486_v11  ;;  %v480_v19 = vadd.f32 %v451_v17, %v261_v9  ;;  %v386_v21 = vpop.f32.mrf.mxu0 }
  0xf5   : > { %v3754_v23 = vadd.f32 %v386_v21, %v3639_v12  ;;  %v3091_v26 = vpop.f32.mrf.mxu1  ;;  %v520_v48 = vld [vmem:[%s3619_s5 + $0x10] sm:$0xff] }
  0xf6   : > { %3135 = vmatmul.mubr.msk.bf16.vlgmr.msra.gmra.mxu0 %vm315_vm0, %v3262_v10  ;;  %504 = vst.msk [vmem:[%s3619_s5 + $0x70] sm:$0xff] %vm220_vm8, %v480_v19  ;;  %v489_v13 = vadd.f32 %v3091_v26, %v270_v18  ;;  %v388_v42 = vpop.f32.mrf.mxu0 }
  0xf7   : > { %2957 = vmatmul.mubr.msk.bf16.vlgmr.msra.gmra.mxu1 %vm315_vm0, %v3261_v45  ;;  %3138 = vmatprep.mubr.msk.bf16.mxu0 %vm315_vm0, %v3263_v15  ;;  %v454_v51 = vpop.f32.mrf.mxu1  ;;  %v529_v61 = vld [vmem:[%s3619_s5 + $0x58] sm:$0xff] }
  0xf8   : > { %1770 = vmatprep.mubr.bf16.mxu1 %v3339_v0  ;;  %2023 = vmatpush1.bf16.msra.mxu0 %v1991_v22  ;;  %513 = vst.msk [vmem:[%s3619_s5 + $0xb8] sm:$0xff] %vm220_vm8, %v489_v13  ;;  %v483_v53 = vadd.f32 %v454_v51, %v264_v27 }
  0xf9   : > { %3143 = vmatpush3.bf16.msra.mxu1 %v3560_v52  ;;  %3152 = vmatprep.subr.bf16.mxu0 %v3573_v56  ;;  %v3265_v52 = vld [vmem:[%s4329_s1 + $0xc0] sm:$0xff]   ;;  %v523_v5 = vld [vmem:[%s3619_s5 + $0x28] sm:$0xff] }
  0xfa   : > { %2302 = vmatprep.subr.bf16.mxu1 %v2272_v29  ;;  %507 = vst.msk [vmem:[%s3619_s5 + $0x88] sm:$0xff] %vm220_vm8, %v483_v53 }
  0xfd   : > { %v532_v17 = vld [vmem:[%s3619_s5 + $0x70] sm:$0xff] }
  0xfe   : > { %3139 = vmatmul.mubr.msk.bf16.gmra.mxu0 %vm315_vm0, %v3264_v31 }
  0xff   : > { %2958 = vmatmul.mubr.msk.bf16.gmra.mxu1 %vm315_vm0, %v3262_v10  ;;  %2040 = vmatprep.mubr.bf16.mxu0 %v3339_v0  ;;  %v538_v10 = vld [vmem:[%s3619_s5 + $0xa0] sm:$0xff] }
 0x100   : > { %1780 = vmatprep.mubr.bf16.mxu1 %v3339_v0 }
 0x101   : > { %v535_v51 = vld [vmem:[%s3619_s5 + $0x88] sm:$0xff] }
 0x106   : > { %2980 = vmatmul.mubr.msk.bf16.vlgmr.msra.gmra.mxu0 %vm315_vm0, %v3265_v52 }
 0x107   : > { %2959 = vmatmul.mubr.msk.bf16.gmra.mxu1 %vm315_vm0, %v3263_v15  ;;  %2050 = vmatprep.mubr.bf16.mxu0 %v3339_v0 }
 0x108   : > { %1790 = vmatprep.mubr.bf16.mxu1 %v3339_v0  ;;  %3153 = vmatpush3.bf16.msra.mxu0 %v3573_v56  ;;  %v3268_v56 = vld [vmem:[%s4329_s1 + $0xd8] sm:$0xff]  }
 0x109   : > { %2582 = vmatprep.subr.bf16.mxu0 %v2552_v54 }
 0x10e   : > { %2981 = vmatmul.mubr.msk.bf16.gmra.mxu0 %vm315_vm0, %v3266_v32 }
 0x10f   : > { %2960 = vmatmul.mubr.msk.bf16.gmra.mxu1 %vm315_vm0, %v3264_v31  ;;  %2060 = vmatprep.mubr.bf16.mxu0 %v3339_v0 }
 0x110   : > { %3144 = vmatprep.mubr.msk.bf16.mxu1 %vm315_vm0, %v3265_v52 }
 0x116   : > { %2982 = vmatmul.mubr.msk.bf16.gmra.mxu0 %vm315_vm0, %v3267_v60 }
 0x117   : > { %3145 = vmatmul.mubr.msk.bf16.vlgmr.msra.gmra.mxu1 %vm315_vm0, %v3266_v32  ;;  %2070 = vmatprep.mubr.bf16.mxu0 %v3339_v0 }
 0x118   : > { %3148 = vmatprep.mubr.msk.bf16.mxu1 %vm315_vm0, %v3267_v60  ;;  %2303 = vmatpush1.bf16.msra.mxu1 %v3579_v59  ;;  %v3270_v59 = vld [vmem:[%s4329_s1 + $0xe8] sm:$0xff]  }
 0x119   : > { %3162 = vmatprep.subr.bf16.mxu1 %v3607_v3 }
 0x11e   : > { %2983 = vmatmul.mubr.msk.bf16.gmra.mxu0 %vm315_vm0, %v3268_v56 }
 0x11f   : > { %3149 = vmatmul.mubr.msk.bf16.gmra.mxu1 %vm315_vm0, %v3268_v56  ;;  %3154 = vmatprep.mubr.msk.bf16.mxu0 %vm315_vm0, %v3269_v35 }
 0x120   : > { %2320 = vmatprep.mubr.bf16.mxu1 %v3339_v0 }
 0x126   : > { %3155 = vmatmul.mubr.msk.bf16.vlgmr.msra.gmra.mxu0 %vm315_vm0, %v3270_v59 }
 0x127   : > { %3003 = vmatmul.mubr.msk.bf16.vlgmr.msra.gmra.mxu1 %vm315_vm0, %v3269_v35  ;;  %3158 = vmatprep.mubr.msk.bf16.mxu0 %vm315_vm0, %v3271_v36 }
 0x128   : > { %2330 = vmatprep.mubr.bf16.mxu1 %v3339_v0  ;;  %2583 = vmatpush1.bf16.msra.mxu0 %v3595_v1  ;;  %v3274_v1 = vld [vmem:[%s4329_s1 + $0x108] sm:$0xff]  }
 0x129   : > { %3163 = vmatpush3.bf16.msra.mxu1 %v3607_v3  ;;  %v3275_v3 = vld [vmem:[%s4329_s1 + $0x110] sm:$0xff]  }
 0x12e   : > { %3159 = vmatmul.mubr.msk.bf16.gmra.mxu0 %vm315_vm0, %v3272_v37 }
 0x12f   : > { %3004 = vmatmul.mubr.msk.bf16.gmra.mxu1 %vm315_vm0, %v3270_v59  ;;  %2600 = vmatprep.mubr.bf16.mxu0 %v3339_v0 }
 0x130   : > { %2340 = vmatprep.mubr.bf16.mxu1 %v3339_v0 }
 0x136   : > { %3026 = vmatmul.mubr.msk.bf16.vlgmr.msra.gmra.mxu0 %vm315_vm0, %v3273_v40 }
 0x137   : > { %3005 = vmatmul.mubr.msk.bf16.gmra.mxu1 %vm315_vm0, %v3271_v36  ;;  %2610 = vmatprep.mubr.bf16.mxu0 %v3339_v0 }
 0x138   : > { %2350 = vmatprep.mubr.bf16.mxu1 %v3339_v0 }
 0x13e   : > { %3027 = vmatmul.mubr.msk.bf16.gmra.mxu0 %vm315_vm0, %v3274_v1 }
 0x13f   : > { %3006 = vmatmul.mubr.msk.bf16.gmra.mxu1 %vm315_vm0, %v3272_v37  ;;  %2620 = vmatprep.mubr.bf16.mxu0 %v3339_v0 }
 0x140   : > { %3164 = vmatprep.mubr.msk.bf16.mxu1 %vm315_vm0, %v3273_v40 }
 0x146   : > { %3028 = vmatmul.mubr.msk.bf16.gmra.mxu0 %vm315_vm0, %v3275_v3 }
 0x147   : > { %3165 = vmatmul.mubr.msk.bf16.vlgmr.msra.gmra.mxu1 %vm315_vm0, %v3274_v1  ;;  %2630 = vmatprep.mubr.bf16.mxu0 %v3339_v0 }
 0x148   : > { %3168 = vmatprep.mubr.msk.bf16.mxu1 %vm315_vm0, %v3275_v3 }
 0x14e   : > { %3029 = vmatmul.mubr.msk.bf16.gmra.mxu0 %vm315_vm0, %v3276_v41 }
 0x14f   : > { %3169 = vmatmul.mubr.msk.bf16.gmra.mxu1 %vm315_vm0, %v3276_v41 }
 0x156   : > { %v3096_v44 = vpop.f32.mrf.mxu0 }
 0x157   : > { %v754_v45 = vadd.f32 %v3096_v44, %v526_v43  ;;  %v642_v47 = vpop.f32.mrf.mxu1 }
 0x158   : > { %v746_v0 = vadd.f32 %v642_v47, %v3674_v20  ;;  %v715_v49 = vpop.f32.mrf.mxu0 }
 0x159   : > { %778 = vst.msk [vmem:[%s3619_s5 + $0x40] sm:$0xff] %vm220_vm8, %v754_v45  ;;  %v748_v50 = vadd.f32 %v715_v49, %v520_v48  ;;  %v644_v57 = vpop.f32.mrf.mxu1 }
 0x15a   : > { %v747_v58 = vadd.f32 %v644_v57, %v3681_v25  ;;  %v3097_v62 = vpop.f32.mrf.mxu0 }
 0x15b   : > { %772 = vst.msk [vmem:[%s3619_s5 + $0x10] sm:$0xff] %vm220_vm8, %v748_v50  ;;  %v757_v2 = vadd.f32 %v3097_v62, %v529_v61  ;;  %v646_v4 = vpop.f32.mrf.mxu1 }
 0x15c   : > { %v749_v20 = vadd.f32 %v646_v4, %v3688_v30  ;;  %v718_v6 = vpop.f32.mrf.mxu0 }
 0x15d   : > { %781 = vst.msk [vmem:[%s3619_s5 + $0x58] sm:$0xff] %vm220_vm8, %v757_v2  ;;  %v751_v8 = vadd.f32 %v718_v6, %v523_v5  ;;  %v648_v9 = vpop.f32.mrf.mxu1 }
 0x15e   : > { %v750_v25 = vadd.f32 %v648_v9, %v3695_v34  ;;  %v3100_v11 = vpop.f32.mrf.mxu0  ;;  %v541_v34 = vld [vmem:[%s3619_s5 + $0xb8] sm:$0xff] }
 0x15f   : > { %775 = vst.msk [vmem:[%s3619_s5 + $0x28] sm:$0xff] %vm220_vm8, %v751_v8  ;;  %v766_v14 = vadd.f32 %v3100_v11, %v538_v10  ;;  %v652_v15 = vpop.f32.mrf.mxu1 }
 0x160   : > { %v752_v30 = vadd.f32 %v652_v15, %v3702_v39  ;;  %v731_v18 = vpop.f32.mrf.mxu0 }
 0x161   : > { %790 = vst.msk [vmem:[%s3619_s5 + $0xa0] sm:$0xff] %vm220_vm8, %v766_v14  ;;  %v760_v19 = vadd.f32 %v731_v18, %v532_v17  ;;  %v654_v21 = vpop.f32.mrf.mxu1 }
 0x162   : > { %v753_v22 = vadd.f32 %v654_v21, %v3711_v46  ;;  %v3101_v26 = vpop.f32.mrf.mxu0 }
 0x163   : > { %784 = vst.msk [vmem:[%s3619_s5 + $0x70] sm:$0xff] %vm220_vm8, %v760_v19  ;;  %v769_v27 = vadd.f32 %v3101_v26, %v541_v34  ;;  %v656_v13 = vpop.f32.mrf.mxu1 }
 0x164   : > { %v755_v29 = vadd.f32 %v656_v13, %v3717_v55  ;;  %v734_v53 = vpop.f32.mrf.mxu0  ;;  %v809_v11 = vld [vmem:[%s3619_s5 + $0x58] sm:$0xff] }
 0x165   : > { %793 = vst.msk [vmem:[%s3619_s5 + $0xb8] sm:$0xff] %vm220_vm8, %v769_v27  ;;  %v763_v39 = vadd.f32 %v734_v53, %v535_v51  ;;  %v658_v31 = vpop.f32.mrf.mxu1 }
 0x166   : > { %v756_v52 = vadd.f32 %v658_v31, %v3726_v63  ;;  %v922_v54 = vpop.f32.mrf.mxu0  ;;  %v482_v63 = vadd.f32 %v388_v42, %v3639_v12  ;;  %v803_v18 = vld [vmem:[%s3619_s5 + $0x28] sm:$0xff] }
 0x167   : > { %787 = vst.msk [vmem:[%s3619_s5 + $0x88] sm:$0xff] %vm220_vm8, %v763_v39  ;;  %v3893_v46 = vadd.f32 %v922_v54, %v746_v0  ;;  %v662_v32 = vpop.f32.mrf.mxu1 }
 0x168   : > { %v758_v60 = vadd.f32 %v662_v32, %v3733_v7  ;;  %v924_v56 = vpop.f32.mrf.mxu0  ;;  %v818_v26 = vld [vmem:[%s3619_s5 + $0xa0] sm:$0xff] }
 0x169   : > { %v3896_v35 = vadd.f32 %v924_v56, %v747_v58  ;;  %v664_v55 = vpop.f32.mrf.mxu1 }
 0x16a   : > { %v759_v59 = vadd.f32 %v664_v55, %v3745_v16  ;;  %v926_v36 = vpop.f32.mrf.mxu0  ;;  %v812_v53 = vld [vmem:[%s3619_s5 + $0x70] sm:$0xff] }
 0x16b   : > { %v3899_v37 = vadd.f32 %v926_v36, %v749_v20  ;;  %v666_v40 = vpop.f32.mrf.mxu1 }
 0x16c   : > { %v761_v1 = vadd.f32 %v666_v40, %v3754_v23  ;;  %v928_v3 = vpop.f32.mrf.mxu0  ;;  %v821_v32 = vld [vmem:[%s3619_s5 + $0xb8] sm:$0xff] }
 0x16d   : > { %v3903_v41 = vadd.f32 %v928_v3, %v750_v25  ;;  %v668_v43 = vpop.f32.mrf.mxu1 }
 0x16e   : > { %v762_v44 = vadd.f32 %v668_v43, %v482_v63  ;;  %v932_v7 = vpop.f32.mrf.mxu0  ;;  %v815_v36 = vld [vmem:[%s3619_s5 + $0x88] sm:$0xff] }
 0x16f   : > { %v3905_v45 = vadd.f32 %v932_v7, %v752_v30  ;;  %v672_v47 = vpop.f32.mrf.mxu1 }
 0x170   : > { %v764_v16 = vadd.f32 %v672_v47, %v3679_v24  ;;  %v934_v0 = vpop.f32.mrf.mxu0 }
 0x171   : > { %v3908_v48 = vadd.f32 %v934_v0, %v753_v22  ;;  %v674_v49 = vpop.f32.mrf.mxu1 }
 0x172   : > { %v765_v12 = vadd.f32 %v674_v49, %v3683_v28  ;;  %v936_v23 = vpop.f32.mrf.mxu0  ;;  %v806_v28 = vld [vmem:[%s3619_s5 + $0x40] sm:$0xff] }
 0x173   : > { %v3911_v42 = vadd.f32 %v936_v23, %v755_v29  ;;  %v676_v50 = vpop.f32.mrf.mxu1 }
 0x174   : > { %v767_v57 = vadd.f32 %v676_v50, %v3691_v33  ;;  %v938_v58 = vpop.f32.mrf.mxu0  ;;  %v800_v33 = vld [vmem:[%s3619_s5 + $0x10] sm:$0xff] }
 0x175   : > { %v3914_v61 = vadd.f32 %v938_v58, %v756_v52  ;;  %v678_v62 = vpop.f32.mrf.mxu1 }
 0x176   : > { %v768_v24 = vadd.f32 %v678_v62, %v3699_v38  ;;  %v942_v2 = vpop.f32.mrf.mxu0 }
 0x177   : > { %v3917_v4 = vadd.f32 %v942_v2, %v758_v60  ;;  %v3106_v20 = vpop.f32.mrf.mxu1 }
 0x178   : > { %v1034_v5 = vadd.f32 %v3106_v20, %v806_v28  ;;  %v944_v6 = vpop.f32.mrf.mxu0 }
 0x179   : > { %v3920_v8 = vadd.f32 %v944_v6, %v759_v59  ;;  %v995_v9 = vpop.f32.mrf.mxu1 }
 0x17a   : > { %1058 = vst.msk [vmem:[%s3619_s5 + $0x40] sm:$0xff] %vm220_vm8, %v1034_v5  ;;  %v1028_v25 = vadd.f32 %v995_v9, %v800_v33  ;;  %v946_v10 = vpop.f32.mrf.mxu0 }
 0x17b   : > { %v3925_v38 = vadd.f32 %v946_v10, %v761_v1  ;;  %v3107_v14 = vpop.f32.mrf.mxu1 }
 0x17c   : > { %1052 = vst.msk [vmem:[%s3619_s5 + $0x10] sm:$0xff] %vm220_vm8, %v1028_v25  ;;  %v1037_v15 = vadd.f32 %v3107_v14, %v809_v11  ;;  %v948_v30 = vpop.f32.mrf.mxu0 }
 0x17d   : > { %v3930_v17 = vadd.f32 %v948_v30, %v762_v44  ;;  %v998_v19 = vpop.f32.mrf.mxu1 }
 0x17e   : > { %1061 = vst.msk [vmem:[%s3619_s5 + $0x58] sm:$0xff] %vm220_vm8, %v1037_v15  ;;  %v1031_v21 = vadd.f32 %v998_v19, %v803_v18  ;;  %v952_v22 = vpop.f32.mrf.mxu0 }
 0x17f   : > { %v3935_v34 = vadd.f32 %v952_v22, %v764_v16  ;;  %v3110_v27 = vpop.f32.mrf.mxu1 }
 0x180   : > { %1055 = vst.msk [vmem:[%s3619_s5 + $0x28] sm:$0xff] %vm220_vm8, %v1031_v21  ;;  %v1046_v13 = vadd.f32 %v3110_v27, %v818_v26  ;;  %v954_v29 = vpop.f32.mrf.mxu0 }
 0x181   : > { %v3940_v51 = vadd.f32 %v954_v29, %v765_v12  ;;  %v1011_v39 = vpop.f32.mrf.mxu1  ;;  %v1086_v1 = vld [vmem:[%s3619_s5 + $0x40] sm:$0xff] }
 0x182   : > { %1070 = vst.msk [vmem:[%s3619_s5 + $0xa0] sm:$0xff] %vm220_vm8, %v1046_v13  ;;  %v1040_v31 = vadd.f32 %v1011_v39, %v812_v53  ;;  %v956_v52 = vpop.f32.mrf.mxu0 }
 0x183   : > { %v3945_v54 = vadd.f32 %v956_v52, %v767_v57  ;;  %v3111_v60 = vpop.f32.mrf.mxu1  ;;  %v1080_v47 = vld [vmem:[%s3619_s5 + $0x10] sm:$0xff] }
 0x184   : > { %1064 = vst.msk [vmem:[%s3619_s5 + $0x70] sm:$0xff] %vm220_vm8, %v1040_v31  ;;  %v1049_v56 = vadd.f32 %v3111_v60, %v821_v32  ;;  %v958_v55 = vpop.f32.mrf.mxu0 }
 0x185   : > { %v3950_v59 = vadd.f32 %v958_v55, %v768_v24  ;;  %v1014_v40 = vpop.f32.mrf.mxu1  ;;  %v1089_v23 = vld [vmem:[%s3619_s5 + $0x58] sm:$0xff] }
 0x186   : > { %1073 = vst.msk [vmem:[%s3619_s5 + $0xb8] sm:$0xff] %vm220_vm8, %v1049_v56  ;;  %v1043_v63 = vadd.f32 %v1014_v40, %v815_v36  ;;  %v3116_v3 = vpop.f32.mrf.mxu0 }
 0x187   : > { %v1314_v43 = vadd.f32 %v3116_v3, %v1086_v1  ;;  %v1202_v44 = vpop.f32.mrf.mxu1  ;;  %v1083_v62 = vld [vmem:[%s3619_s5 + $0x28] sm:$0xff] }
 0x188   : > { %1067 = vst.msk [vmem:[%s3619_s5 + $0x88] sm:$0xff] %vm220_vm8, %v1043_v63  ;;  %v1306_v7 = vadd.f32 %v1202_v44, %v3893_v46  ;;  %v1275_v16 = vpop.f32.mrf.mxu0 }
 0x189   : > { %1338 = vst.msk [vmem:[%s3619_s5 + $0x40] sm:$0xff] %vm220_vm8, %v1314_v43  ;;  %v1308_v0 = vadd.f32 %v1275_v16, %v1080_v47  ;;  %v1204_v49 = vpop.f32.mrf.mxu1  ;;  %v1098_v20 = vld [vmem:[%s3619_s5 + $0xa0] sm:$0xff] }
 0x18a   : > { %v1307_v12 = vadd.f32 %v1204_v49, %v3896_v35  ;;  %v3117_v50 = vpop.f32.mrf.mxu0 }
 0x18b   : > { %1332 = vst.msk [vmem:[%s3619_s5 + $0x10] sm:$0xff] %vm220_vm8, %v1308_v0  ;;  %v1317_v57 = vadd.f32 %v3117_v50, %v1089_v23  ;;  %v1206_v58 = vpop.f32.mrf.mxu1  ;;  %v1092_v9 = vld [vmem:[%s3619_s5 + $0x70] sm:$0xff] }
 0x18c   : > { %v1309_v46 = vadd.f32 %v1206_v58, %v3899_v37  ;;  %v1278_v24 = vpop.f32.mrf.mxu0 }
 0x18d   : > { %1341 = vst.msk [vmem:[%s3619_s5 + $0x58] sm:$0xff] %vm220_vm8, %v1317_v57  ;;  %v1311_v2 = vadd.f32 %v1278_v24, %v1083_v62  ;;  %v1208_v28 = vpop.f32.mrf.mxu1 }
 0x18e   : > { %v1310_v35 = vadd.f32 %v1208_v28, %v3903_v41  ;;  %v3120_v5 = vpop.f32.mrf.mxu0  ;;  %v1101_v41 = vld [vmem:[%s3619_s5 + $0xb8] sm:$0xff] }
 0x18f   : > { %1335 = vst.msk [vmem:[%s3619_s5 + $0x28] sm:$0xff] %vm220_vm8, %v1311_v2  ;;  %v1326_v6 = vadd.f32 %v3120_v5, %v1098_v20  ;;  %v1212_v33 = vpop.f32.mrf.mxu1  ;;  %v1095_v21 = vld [vmem:[%s3619_s5 + $0x88] sm:$0xff] }
 0x190   : > { %v1312_v37 = vadd.f32 %v1212_v33, %v3905_v45  ;;  %v1291_v25 = vpop.f32.mrf.mxu0 }
 0x191   : > { %1350 = vst.msk [vmem:[%s3619_s5 + $0xa0] sm:$0xff] %vm220_vm8, %v1326_v6  ;;  %v1320_v10 = vadd.f32 %v1291_v25, %v1092_v9  ;;  %v1214_v11 = vpop.f32.mrf.mxu1 }
 0x192   : > { %v1313_v14 = vadd.f32 %v1214_v11, %v3908_v48  ;;  %v3121_v15 = vpop.f32.mrf.mxu0 }
 0x193   : > { %1344 = vst.msk [vmem:[%s3619_s5 + $0x70] sm:$0xff] %vm220_vm8, %v1320_v10  ;;  %v1329_v30 = vadd.f32 %v3121_v15, %v1101_v41  ;;  %v1216_v18 = vpop.f32.mrf.mxu1 }
 0x194   : > { %v1315_v19 = vadd.f32 %v1216_v18, %v3911_v42  ;;  %v1294_v22 = vpop.f32.mrf.mxu0  ;;  %v1369_v20 = vld [vmem:[%s3619_s5 + $0x58] sm:$0xff] }
 0x195   : > { %1353 = vst.msk [vmem:[%s3619_s5 + $0xb8] sm:$0xff] %vm220_vm8, %v1329_v30  ;;  %v1323_v45 = vadd.f32 %v1294_v22, %v1095_v21  ;;  %v1218_v26 = vpop.f32.mrf.mxu1 }
 0x196   : > { %v1316_v27 = vadd.f32 %v1218_v26, %v3914_v61  ;;  %v1482_v13 = vpop.f32.mrf.mxu0  ;;  %v1363_v9 = vld [vmem:[%s3619_s5 + $0x28] sm:$0xff] }
 0x197   : > { %1347 = vst.msk [vmem:[%s3619_s5 + $0x88] sm:$0xff] %vm220_vm8, %v1323_v45  ;;  %v3989_v48 = vadd.f32 %v1482_v13, %v1306_v7  ;;  %v1222_v29 = vpop.f32.mrf.mxu1 }
 0x198   : > { %v1318_v53 = vadd.f32 %v1222_v29, %v3917_v4  ;;  %v1484_v39 = vpop.f32.mrf.mxu0  ;;  %v1378_v41 = vld [vmem:[%s3619_s5 + $0xa0] sm:$0xff] }
 0x199   : > { %v3992_v31 = vadd.f32 %v1484_v39, %v1307_v12  ;;  %v1224_v42 = vpop.f32.mrf.mxu1 }
 0x19a   : > { %v1319_v52 = vadd.f32 %v1224_v42, %v3920_v8  ;;  %v1486_v32 = vpop.f32.mrf.mxu0  ;;  %v1372_v21 = vld [vmem:[%s3619_s5 + $0x70] sm:$0xff] }
 0x19b   : > { %v3995_v60 = vadd.f32 %v1486_v32, %v1309_v46  ;;  %v1226_v56 = vpop.f32.mrf.mxu1 }
 0x19c   : > { %v1321_v61 = vadd.f32 %v1226_v56, %v3925_v38  ;;  %v1488_v55 = vpop.f32.mrf.mxu0  ;;  %v1381_v13 = vld [vmem:[%s3619_s5 + $0xb8] sm:$0xff] }
 0x19d   : > { %v3998_v36 = vadd.f32 %v1488_v55, %v1310_v35  ;;  %v1228_v40 = vpop.f32.mrf.mxu1 }
 0x19e   : > { %v1322_v63 = vadd.f32 %v1228_v40, %v3930_v17  ;;  %v1492_v1 = vpop.f32.mrf.mxu0 }
 0x19f   : > { %v4001_v4 = vadd.f32 %v1492_v1, %v1312_v37  ;;  %v1232_v3 = vpop.f32.mrf.mxu1 }
 0x1a0   : > { %v1324_v43 = vadd.f32 %v1232_v3, %v3935_v34  ;;  %v1494_v8 = vpop.f32.mrf.mxu0 }
 0x1a1   : > { %v4004_v44 = vadd.f32 %v1494_v8, %v1313_v14  ;;  %v1234_v7 = vpop.f32.mrf.mxu1 }
 0x1a2   : > { %v1325_v47 = vadd.f32 %v1234_v7, %v3940_v51  ;;  %v1496_v38 = vpop.f32.mrf.mxu0  ;;  %v1366_v51 = vld [vmem:[%s3619_s5 + $0x40] sm:$0xff] }
 0x1a3   : > { %v4007_v16 = vadd.f32 %v1496_v38, %v1315_v19  ;;  %v1236_v0 = vpop.f32.mrf.mxu1 }
 0x1a4   : > { %v1327_v17 = vadd.f32 %v1236_v0, %v3945_v54  ;;  %v1498_v49 = vpop.f32.mrf.mxu0  ;;  %v1360_v54 = vld [vmem:[%s3619_s5 + $0x10] sm:$0xff] }
 0x1a5   : > { %v4010_v12 = vadd.f32 %v1498_v49, %v1316_v27  ;;  %v1238_v23 = vpop.f32.mrf.mxu1 }
 0x1a6   : > { %v1328_v34 = vadd.f32 %v1238_v23, %v3950_v59  ;;  %v1502_v50 = vpop.f32.mrf.mxu0 }
 0x1a7   : > { %v4013_v57 = vadd.f32 %v1502_v50, %v1318_v53  ;;  %v3126_v58 = vpop.f32.mrf.mxu1 }
 0x1a8   : > { %v1594_v46 = vadd.f32 %v3126_v58, %v1366_v51  ;;  %v1504_v62 = vpop.f32.mrf.mxu0 }
 0x1a9   : > { %v4016_v24 = vadd.f32 %v1504_v62, %v1319_v52  ;;  %v1555_v2 = vpop.f32.mrf.mxu1  ;;  %v1375_v52 = vld [vmem:[%s3619_s5 + $0x88] sm:$0xff] }
 0x1aa   : > { %1618 = vst.msk [vmem:[%s3619_s5 + $0x40] sm:$0xff] %vm220_vm8, %v1594_v46  ;;  %v1588_v28 = vadd.f32 %v1555_v2, %v1360_v54  ;;  %v1506_v35 = vpop.f32.mrf.mxu0 }
 0x1ab   : > { %v4021_v59 = vadd.f32 %v1506_v35, %v1321_v61  ;;  %v3127_v5 = vpop.f32.mrf.mxu1 }
 0x1ac   : > { %1612 = vst.msk [vmem:[%s3619_s5 + $0x10] sm:$0xff] %vm220_vm8, %v1588_v28  ;;  %v1597_v6 = vadd.f32 %v3127_v5, %v1369_v20  ;;  %v1508_v33 = vpop.f32.mrf.mxu0 }
 0x1ad   : > { %v4026_v37 = vadd.f32 %v1508_v33, %v1322_v63  ;;  %v1558_v25 = vpop.f32.mrf.mxu1 }
 0x1ae   : > { %1621 = vst.msk [vmem:[%s3619_s5 + $0x58] sm:$0xff] %vm220_vm8, %v1597_v6  ;;  %v1591_v10 = vadd.f32 %v1558_v25, %v1363_v9  ;;  %v1512_v11 = vpop.f32.mrf.mxu0 }
 0x1af   : > { %v4031_v14 = vadd.f32 %v1512_v11, %v1324_v43  ;;  %v3130_v15 = vpop.f32.mrf.mxu1 }
 0x1b0   : > { %1615 = vst.msk [vmem:[%s3619_s5 + $0x28] sm:$0xff] %vm220_vm8, %v1591_v10  ;;  %v1606_v30 = vadd.f32 %v3130_v15, %v1378_v41  ;;  %v1514_v18 = vpop.f32.mrf.mxu0 }
 0x1b1   : > { %v4036_v19 = vadd.f32 %v1514_v18, %v1325_v47  ;;  %v1571_v22 = vpop.f32.mrf.mxu1  ;;  %v1646_v61 = vld [vmem:[%s3619_s5 + $0x40] sm:$0xff] }
 0x1b2   : > { %1630 = vst.msk [vmem:[%s3619_s5 + $0xa0] sm:$0xff] %vm220_vm8, %v1606_v30  ;;  %v1600_v45 = vadd.f32 %v1571_v22, %v1372_v21  ;;  %v1516_v26 = vpop.f32.mrf.mxu0 }
 0x1b3   : > { %v4041_v27 = vadd.f32 %v1516_v26, %v1327_v17  ;;  %v3131_v29 = vpop.f32.mrf.mxu1  ;;  %v1640_v1 = vld [vmem:[%s3619_s5 + $0x10] sm:$0xff] }
 0x1b4   : > { %1624 = vst.msk [vmem:[%s3619_s5 + $0x70] sm:$0xff] %vm220_vm8, %v1600_v45  ;;  %v1609_v53 = vadd.f32 %v3131_v29, %v1381_v13  ;;  %v1518_v39 = vpop.f32.mrf.mxu0 }
 0x1b5   : > { %v4046_v42 = vadd.f32 %v1518_v39, %v1328_v34  ;;  %v1574_v32 = vpop.f32.mrf.mxu1  ;;  %v1649_v7 = vld [vmem:[%s3619_s5 + $0x58] sm:$0xff] }
 0x1b6   : > { %1633 = vst.msk [vmem:[%s3619_s5 + $0xb8] sm:$0xff] %vm220_vm8, %v1609_v53  ;;  %v1603_v56 = vadd.f32 %v1574_v32, %v1375_v52  ;;  %v3136_v55 = vpop.f32.mrf.mxu0 }
 0x1b7   : > { %v1874_v40 = vadd.f32 %v3136_v55, %v1646_v61  ;;  %v4052_v63 = vpop.f32.mrf.mxu1  ;;  %v1643_v17 = vld [vmem:[%s3619_s5 + $0x28] sm:$0xff] }
 0x1b8   : > { %1627 = vst.msk [vmem:[%s3619_s5 + $0x88] sm:$0xff] %vm220_vm8, %v1603_v56  ;;  %v1835_v3 = vpop.f32.mrf.mxu0 }
 0x1b9   : > { %1898 = vst.msk [vmem:[%s3619_s5 + $0x40] sm:$0xff] %vm220_vm8, %v1874_v40  ;;  %v1868_v43 = vadd.f32 %v1835_v3, %v1640_v1  ;;  %v4059_v8 = vpop.f32.mrf.mxu1  ;;  %v1658_v50 = vld [vmem:[%s3619_s5 + $0xa0] sm:$0xff] }
 0x1ba   : > { %v3137_v47 = vpop.f32.mrf.mxu0 }
 0x1bb   : > { %1892 = vst.msk [vmem:[%s3619_s5 + $0x10] sm:$0xff] %vm220_vm8, %v1868_v43  ;;  %v1877_v38 = vadd.f32 %v3137_v47, %v1649_v7  ;;  %v4064_v0 = vpop.f32.mrf.mxu1  ;;  %v1652_v62 = vld [vmem:[%s3619_s5 + $0x70] sm:$0xff] }
 0x1bc   : > { %v1838_v49 = vpop.f32.mrf.mxu0 }
 0x1bd   : > { %1901 = vst.msk [vmem:[%s3619_s5 + $0x58] sm:$0xff] %vm220_vm8, %v1877_v38  ;;  %v1871_v23 = vadd.f32 %v1838_v49, %v1643_v17  ;;  %v4069_v34 = vpop.f32.mrf.mxu1  ;;  %v1661_v35 = vld [vmem:[%s3619_s5 + $0xb8] sm:$0xff] }
 0x1be   : > { %v3140_v51 = vpop.f32.mrf.mxu0 }
 0x1bf   : > { %1895 = vst.msk [vmem:[%s3619_s5 + $0x28] sm:$0xff] %vm220_vm8, %v1871_v23  ;;  %v1886_v58 = vadd.f32 %v3140_v51, %v1658_v50  ;;  %v4074_v46 = vpop.f32.mrf.mxu1  ;;  %v1655_v33 = vld [vmem:[%s3619_s5 + $0x88] sm:$0xff] }
 0x1c0   : > { %v1851_v54 = vpop.f32.mrf.mxu0  ;;  %v1926_v55 = vld [vmem:[%s3619_s5 + $0x40] sm:$0xff] }
 0x1c1   : > { %1910 = vst.msk [vmem:[%s3619_s5 + $0xa0] sm:$0xff] %vm220_vm8, %v1886_v58  ;;  %v1880_v2 = vadd.f32 %v1851_v54, %v1652_v62  ;;  %v4079_v28 = vpop.f32.mrf.mxu1 }
 0x1c2   : > { %v3141_v20 = vpop.f32.mrf.mxu0  ;;  %v1920_v43 = vld [vmem:[%s3619_s5 + $0x10] sm:$0xff] }
 0x1c3   : > { %1904 = vst.msk [vmem:[%s3619_s5 + $0x70] sm:$0xff] %vm220_vm8, %v1880_v2  ;;  %v1889_v5 = vadd.f32 %v3141_v20, %v1661_v35  ;;  %v4084_v6 = vpop.f32.mrf.mxu1 }
 0x1c4   : > { %v1854_v9 = vpop.f32.mrf.mxu0  ;;  %v1929_v17 = vld [vmem:[%s3619_s5 + $0x58] sm:$0xff] }
 0x1c5   : > { %1913 = vst.msk [vmem:[%s3619_s5 + $0xb8] sm:$0xff] %vm220_vm8, %v1889_v5  ;;  %v1883_v25 = vadd.f32 %v1854_v9, %v1655_v33  ;;  %v4089_v10 = vpop.f32.mrf.mxu1 }
 0x1c6   : > { %v4091_v11 = vpop.f32.mrf.mxu0  ;;  %v1923_v51 = vld [vmem:[%s3619_s5 + $0x28] sm:$0xff] }
 0x1c7   : > { %1907 = vst.msk [vmem:[%s3619_s5 + $0x88] sm:$0xff] %vm220_vm8, %v1883_v25  ;;  %v4095_v41 = vpop.f32.mrf.mxu1 }
 0x1c8   : > { %v4097_v15 = vpop.f32.mrf.mxu0  ;;  %v1938_v2 = vld [vmem:[%s3619_s5 + $0xa0] sm:$0xff] }
 0x1c9   : > { %v4099_v30 = vpop.f32.mrf.mxu1 }
 0x1ca   : > { %v4101_v18 = vpop.f32.mrf.mxu0  ;;  %v1932_v33 = vld [vmem:[%s3619_s5 + $0x70] sm:$0xff] }
 0x1cb   : > { %v4103_v21 = vpop.f32.mrf.mxu1 }
 0x1cc   : > { %v4105_v22 = vpop.f32.mrf.mxu0 }
 0x1cd   : > { %v4107_v45 = vpop.f32.mrf.mxu1 }
 0x1ce   : > { %v4109_v26 = vpop.f32.mrf.mxu0 }
 0x1cf   : > { %v4111_v13 = vpop.f32.mrf.mxu1 }
 0x1d0   : > { %v4113_v29 = vpop.f32.mrf.mxu0 }
 0x1d1   : > { %v4115_v53 = vpop.f32.mrf.mxu1 }
 0x1d2   : > { %v4117_v39 = vpop.f32.mrf.mxu0 }
 0x1d3   : > { %v4119_v52 = vpop.f32.mrf.mxu1 }
 0x1d4   : > { %v4121_v32 = vpop.f32.mrf.mxu0 }
 0x1d5   : > { %v4123_v56 = vpop.f32.mrf.mxu1 }
 0x1d6   : > { %4334 = vst [vmem:[#allocation5_spill] sm:$0xff] %v4123_v56  ;;  %v4125_v61 = vpop.f32.mrf.mxu0 }
 0x1d7   : > { %v3146_v40 = vpop.f32.mrf.mxu1 }
 0x1d8   : > { %v2154_v1 = vadd.f32 %v3146_v40, %v1926_v55  ;;  %v4128_v3 = vpop.f32.mrf.mxu0  ;;  %v1941_v40 = vld [vmem:[%s3619_s5 + $0xb8] sm:$0xff] }
 0x1d9   : > { %v2115_v7 = vpop.f32.mrf.mxu1 }
 0x1da   : > { %2178 = vst.msk [vmem:[%s3619_s5 + $0x40] sm:$0xff] %vm220_vm8, %v2154_v1  ;;  %v2148_v47 = vadd.f32 %v2115_v7, %v1920_v43  ;;  %v4133_v38 = vpop.f32.mrf.mxu0 }
 0x1db   : > { %v3147_v49 = vpop.f32.mrf.mxu1 }
 0x1dc   : > { %2172 = vst.msk [vmem:[%s3619_s5 + $0x10] sm:$0xff] %vm220_vm8, %v2148_v47  ;;  %v2157_v23 = vadd.f32 %v3147_v49, %v1929_v17  ;;  %v4138_v50 = vpop.f32.mrf.mxu0  ;;  %v1935_v47 = vld [vmem:[%s3619_s5 + $0x88] sm:$0xff] }
 0x1dd   : > { %v2118_v58 = vpop.f32.mrf.mxu1 }
 0x1de   : > { %2181 = vst.msk [vmem:[%s3619_s5 + $0x58] sm:$0xff] %vm220_vm8, %v2157_v23  ;;  %v2151_v62 = vadd.f32 %v2118_v58, %v1923_v51  ;;  %v4143_v54 = vpop.f32.mrf.mxu0 }
 0x1df   : > { %v3150_v35 = vpop.f32.mrf.mxu1 }
 0x1e0   : > { %2175 = vst.msk [vmem:[%s3619_s5 + $0x28] sm:$0xff] %vm220_vm8, %v2151_v62  ;;  %v2166_v20 = vadd.f32 %v3150_v35, %v1938_v2  ;;  %v4148_v5 = vpop.f32.mrf.mxu0 }
 0x1e1   : > { %v2131_v9 = vpop.f32.mrf.mxu1  ;;  %v2206_v23 = vld [vmem:[%s3619_s5 + $0x40] sm:$0xff] }
 0x1e2   : > { %2190 = vst.msk [vmem:[%s3619_s5 + $0xa0] sm:$0xff] %vm220_vm8, %v2166_v20  ;;  %v2160_v25 = vadd.f32 %v2131_v9, %v1932_v33  ;;  %v4153_v55 = vpop.f32.mrf.mxu0 }
 0x1e3   : > { %4335 = vst [vmem:[#allocation6_spill] sm:$0xff] %v4153_v55  ;;  %v3151_v1 = vpop.f32.mrf.mxu1  ;;  %v2200_v2 = vld [vmem:[%s3619_s5 + $0x10] sm:$0xff] }
 0x1e4   : > { %2184 = vst.msk [vmem:[%s3619_s5 + $0x70] sm:$0xff] %vm220_vm8, %v2160_v25  ;;  %v2169_v43 = vadd.f32 %v3151_v1, %v1941_v40  ;;  %v4158_v7 = vpop.f32.mrf.mxu0 }
 0x1e5   : > { %4336 = vst [vmem:[#allocation7_spill] sm:$0xff] %v4158_v7  ;;  %v2134_v17 = vpop.f32.mrf.mxu1  ;;  %v2209_v9 = vld [vmem:[%s3619_s5 + $0x58] sm:$0xff]  ;;  %v1867_v7 = vadd.f32 %v4059_v8, %v3992_v31 }
 0x1e6   : > { %2193 = vst.msk [vmem:[%s3619_s5 + $0xb8] sm:$0xff] %vm220_vm8, %v2169_v43  ;;  %v2163_v49 = vadd.f32 %v2134_v17, %v1935_v47  ;;  %v3156_v51 = vpop.f32.mrf.mxu0 }
 0x1e7   : > { %v2434_v58 = vadd.f32 %v3156_v51, %v2206_v23  ;;  %v2322_v62 = vpop.f32.mrf.mxu1  ;;  %v2203_v43 = vld [vmem:[%s3619_s5 + $0x28] sm:$0xff] }
 0x1e8   : > { %2187 = vst.msk [vmem:[%s3619_s5 + $0x88] sm:$0xff] %vm220_vm8, %v2163_v49  ;;  %v2395_v35 = vpop.f32.mrf.mxu0 }
 0x1e9   : > { %2458 = vst.msk [vmem:[%s3619_s5 + $0x40] sm:$0xff] %vm220_vm8, %v2434_v58  ;;  %v2428_v20 = vadd.f32 %v2395_v35, %v2200_v2  ;;  %v2324_v33 = vpop.f32.mrf.mxu1  ;;  %v2218_v23 = vld [vmem:[%s3619_s5 + $0xa0] sm:$0xff] }
 0x1ea   : > { %v3157_v25 = vpop.f32.mrf.mxu0 }
 0x1eb   : > { %2452 = vst.msk [vmem:[%s3619_s5 + $0x10] sm:$0xff] %vm220_vm8, %v2428_v20  ;;  %v2437_v40 = vadd.f32 %v3157_v25, %v2209_v9  ;;  %v2326_v1 = vpop.f32.mrf.mxu1  ;;  %v2212_v35 = vld [vmem:[%s3619_s5 + $0x70] sm:$0xff]  ;;  %v1866_v9 = vadd.f32 %v4052_v63, %v3989_v48  ;;  %v1869_v48 = vadd.f32 %v4064_v0, %v3995_v60  ;;  %v2147_v63 = vadd.f32 %v4097_v15, %v1867_v7 }
 0x1ec   : > { %v2398_v47 = vpop.f32.mrf.mxu0  ;;  %v1872_v15 = vadd.f32 %v4074_v46, %v4001_v4  ;;  %v1875_v4 = vadd.f32 %v4084_v6, %v4007_v16  ;;  %v1878_v16 = vadd.f32 %v4095_v41, %v4013_v57  ;;  %v1881_v41 = vadd.f32 %v4103_v21, %v4021_v59 }
 0x1ed   : > { %2461 = vst.msk [vmem:[%s3619_s5 + $0x58] sm:$0xff] %vm220_vm8, %v2437_v40  ;;  %v2431_v17 = vadd.f32 %v2398_v47, %v2203_v43  ;;  %v2328_v49 = vpop.f32.mrf.mxu1  ;;  %v2221_v43 = vld [vmem:[%s3619_s5 + $0xb8] sm:$0xff] }
 0x1ee   : > { %v3160_v51 = vpop.f32.mrf.mxu0 }
 0x1ef   : > { %2455 = vst.msk [vmem:[%s3619_s5 + $0x28] sm:$0xff] %vm220_vm8, %v2431_v17  ;;  %v2446_v58 = vadd.f32 %v3160_v51, %v2218_v23  ;;  %v2332_v2 = vpop.f32.mrf.mxu1  ;;  %v2146_v17 = vadd.f32 %v4091_v11, %v1866_v9  ;;  %v2215_v55 = vld [vmem:[%s3619_s5 + $0x88] sm:$0xff]  ;;  %v1870_v11 = vadd.f32 %v4069_v34, %v3998_v36  ;;  %v2427_v9 = vadd.f32 %v2324_v33, %v2147_v63 }
 0x1f0   : > { %v2411_v20 = vpop.f32.mrf.mxu0  ;;  %v1873_v34 = vadd.f32 %v4079_v28, %v4004_v44  ;;  %v1876_v44 = vadd.f32 %v4089_v10, %v4010_v12  ;;  %v2155_v28 = vadd.f32 %v4117_v39, %v1875_v4  ;;  %v1879_v12 = vadd.f32 %v4099_v30, %v4016_v24 }
 0x1f1   : > { %2470 = vst.msk [vmem:[%s3619_s5 + $0xa0] sm:$0xff] %vm220_vm8, %v2446_v58  ;;  %v2440_v25 = vadd.f32 %v2411_v20, %v2212_v35  ;;  %v2334_v40 = vpop.f32.mrf.mxu1  ;;  %v2426_v58 = vadd.f32 %v2322_v62, %v2146_v17  ;;  %v2149_v20 = vadd.f32 %v4101_v18, %v1869_v48  ;;  %v2150_v7 = vadd.f32 %v4105_v22, %v1870_v11 }
 0x1f2   : > { %v3161_v47 = vpop.f32.mrf.mxu0  ;;  %v2152_v18 = vadd.f32 %v4109_v26, %v1872_v15  ;;  %v2153_v46 = vadd.f32 %v4113_v29, %v1873_v34  ;;  %v2156_v6 = vadd.f32 %v4121_v32, %v1876_v44  ;;  %v2158_v10 = vadd.f32 %v4125_v61, %v1878_v16 }
 0x1f3   : > { %2464 = vst.msk [vmem:[%s3619_s5 + $0x70] sm:$0xff] %vm220_vm8, %v2440_v25  ;;  %v2449_v23 = vadd.f32 %v3161_v47, %v2221_v43  ;;  %v2336_v51 = vpop.f32.mrf.mxu1  ;;  %v2430_v33 = vadd.f32 %v2328_v49, %v2150_v7  ;;  %v2159_v32 = vadd.f32 %v4128_v3, %v1879_v12  ;;  %v1882_v30 = vadd.f32 %v4107_v45, %v4026_v37  ;;  %v2480_v45 = vld [vmem:[%s3619_s5 + $0x10] sm:$0xff] }
 0x1f4   : > { %v2414_v56 = vpop.f32.mrf.mxu0  ;;  %v2432_v22 = vadd.f32 %v2332_v2, %v2152_v18  ;;  %v2433_v26 = vadd.f32 %v2334_v40, %v2153_v46  ;;  %v2435_v29 = vadd.f32 %v2336_v51, %v2155_v28  ;;  %v2161_v61 = vadd.f32 %v4133_v38, %v1881_v41 }
 0x1f5   : > { %2473 = vst.msk [vmem:[%s3619_s5 + $0xb8] sm:$0xff] %vm220_vm8, %v2449_v23  ;;  %v2443_v35 = vadd.f32 %v2414_v56, %v2215_v55  ;;  %v2338_v31 = vpop.f32.mrf.mxu1  ;;  %v2429_v56 = vadd.f32 %v2326_v1, %v2149_v20  ;;  %v2162_v15 = vadd.f32 %v4138_v50, %v1882_v30  ;;  %v2489_v50 = vld [vmem:[%s3619_s5 + $0x58] sm:$0xff] }
 0x1f6   : > { %v2602_v8 = vpop.f32.mrf.mxu0  ;;  %v2436_v39 = vadd.f32 %v2338_v31, %v2156_v6 }
 0x1f7   : > { %2467 = vst.msk [vmem:[%s3619_s5 + $0x88] sm:$0xff] %vm220_vm8, %v2443_v35  ;;  %v2706_v25 = vadd.f32 %v2602_v8, %v2426_v58  ;;  %v2342_v60 = vpop.f32.mrf.mxu1 }
 0x1f8   : > { %v2604_v0 = vpop.f32.mrf.mxu0  ;;  %v2438_v51 = vadd.f32 %v2342_v60, %v2158_v10  ;;  %v1884_v60 = vadd.f32 %v4111_v13, %v4031_v14 }
 0x1f9   : > { %2730 = vst [vmem:[%s3619_s5] sm:$0xff] %v2706_v25  ;;  %v2707_v55 = vadd.f32 %v2604_v0, %v2427_v9  ;;  %v2344_v62 = vpop.f32.mrf.mxu1  ;;  %v2486_v0 = vld [vmem:[%s3619_s5 + $0x40] sm:$0xff] }
 0x1fa   : > { %v2606_v36 = vpop.f32.mrf.mxu0  ;;  %v2439_v31 = vadd.f32 %v2344_v62, %v2159_v32  ;;  %v1885_v62 = vadd.f32 %v4115_v53, %v4036_v19  ;;  %v2492_v16 = vld [vmem:[%s3619_s5 + $0x70] sm:$0xff] }
 0x1fb   : > { %2731 = vst [vmem:[%s3619_s5 + $0x8] sm:$0xff] %v2707_v55  ;;  %v2709_v43 = vadd.f32 %v2606_v36, %v2429_v56  ;;  %v2346_v47 = vpop.f32.mrf.mxu1  ;;  %v2164_v36 = vadd.f32 %v4143_v54, %v1884_v60  ;;  %v2483_v54 = vld [vmem:[%s3619_s5 + $0x28] sm:$0xff] }
 0x1fc   : > { %v2608_v17 = vpop.f32.mrf.mxu0  ;;  %v2441_v7 = vadd.f32 %v2346_v47, %v2161_v61  ;;  %v2165_v47 = vadd.f32 %v4148_v5, %v1885_v62  ;;  %v2501_v12 = vld [vmem:[%s3619_s5 + $0xb8] sm:$0xff] }
 0x1fd   : > { %2733 = vst [vmem:[%s3619_s5 + $0x18] sm:$0xff] %v2709_v43  ;;  %v2710_v1 = vadd.f32 %v2608_v17, %v2430_v33  ;;  %v2348_v23 = vpop.f32.mrf.mxu1  ;;  %v1887_v43 = vadd.f32 %v4119_v52, %v4041_v27 }
 0x1fe   : > { %v2612_v48 = vpop.f32.mrf.mxu0  ;;  %v2442_v14 = vadd.f32 %v2348_v23, %v2162_v15  ;;  %v4338_v23 = vld [vmem:[#allocation6_spill] sm:$0xff] }
 0x1ff   : > { %2734 = vst [vmem:[%s3619_s5 + $0x20] sm:$0xff] %v2710_v1  ;;  %v2712_v49 = vadd.f32 %v2612_v48, %v2432_v22  ;;  %v2352_v63 = vpop.f32.mrf.mxu1  ;;  %v4337_v22 = vld [vmem:[#allocation5_spill] sm:$0xff]  ;;  %v2167_v27 = vadd.f32 %v4338_v23, %v1887_v43 }
 0x200   : > { %v2614_v58 = vpop.f32.mrf.mxu0  ;;  %v2444_v19 = vadd.f32 %v2352_v63, %v2164_v36  ;;  %v1888_v1 = vadd.f32 %v4337_v22, %v4046_v42  ;;  %v2498_v48 = vld [vmem:[%s3619_s5 + $0xa0] sm:$0xff] }
 0x201   : > { %2736 = vst [vmem:[%s3619_s5 + $0x30] sm:$0xff] %v2712_v49  ;;  %v2713_v2 = vadd.f32 %v2614_v58, %v2433_v26  ;;  %v2354_v35 = vpop.f32.mrf.mxu1  ;;  %v4339_v49 = vld [vmem:[#allocation7_spill] sm:$0xff] }
 0x202   : > { %v2616_v8 = vpop.f32.mrf.mxu0  ;;  %v2445_v52 = vadd.f32 %v2354_v35, %v2165_v47  ;;  %v2168_v63 = vadd.f32 %v4339_v49, %v1888_v1 }
 0x203   : > { %2737 = vst [vmem:[%s3619_s5 + $0x38] sm:$0xff] %v2713_v2  ;;  %v2715_v40 = vadd.f32 %v2616_v8, %v2435_v29  ;;  %v2356_v11 = vpop.f32.mrf.mxu1 }
 0x204   : > { %v2618_v57 = vpop.f32.mrf.mxu0  ;;  %v2447_v42 = vadd.f32 %v2356_v11, %v2167_v27 }
 0x205   : > { %2739 = vst [vmem:[%s3619_s5 + $0x48] sm:$0xff] %v2715_v40  ;;  %v2716_v20 = vadd.f32 %v2618_v57, %v2436_v39  ;;  %v2358_v9 = vpop.f32.mrf.mxu1  ;;  %v2495_v57 = vld [vmem:[%s3619_s5 + $0x88] sm:$0xff] }
 0x206   : > { %v2622_v24 = vpop.f32.mrf.mxu0  ;;  %v2448_v35 = vadd.f32 %v2358_v9, %v2168_v63 }
 0x207   : > { %2740 = vst [vmem:[%s3619_s5 + $0x50] sm:$0xff] %v2716_v20  ;;  %v2718_v25 = vadd.f32 %v2622_v24, %v2438_v51  ;;  %v3166_v59 = vpop.f32.mrf.mxu1 }
 0x208   : > { %v2714_v21 = vadd.f32 %v3166_v59, %v2486_v0  ;;  %v2624_v3 = vpop.f32.mrf.mxu0 }
 0x209   : > { %2742 = vst [vmem:[%s3619_s5 + $0x60] sm:$0xff] %v2718_v25  ;;  %v2719_v37 = vadd.f32 %v2624_v3, %v2439_v31  ;;  %v2675_v38 = vpop.f32.mrf.mxu1 }
 0x20a   : > { %2738 = vst.msk [vmem:[%s3619_s5 + $0x40] sm:$0xff] %vm220_vm8, %v2714_v21  ;;  %v2708_v56 = vadd.f32 %v2675_v38, %v2480_v45  ;;  %v2626_v55 = vpop.f32.mrf.mxu0 }
 0x20b   : > { %2743 = vst [vmem:[%s3619_s5 + $0x68] sm:$0xff] %v2719_v37  ;;  %v2721_v13 = vadd.f32 %v2626_v55, %v2441_v7  ;;  %v3167_v34 = vpop.f32.mrf.mxu1 }
 0x20c   : > { %2732 = vst.msk [vmem:[%s3619_s5 + $0x10] sm:$0xff] %vm220_vm8, %v2708_v56  ;;  %v2717_v18 = vadd.f32 %v3167_v34, %v2489_v50  ;;  %v2628_v33 = vpop.f32.mrf.mxu0 }
 0x20d   : > { %2745 = vst [vmem:[%s3619_s5 + $0x78] sm:$0xff] %v2721_v13  ;;  %v2722_v53 = vadd.f32 %v2628_v33, %v2442_v14  ;;  %v2678_v17 = vpop.f32.mrf.mxu1 }
 0x20e   : > { %2741 = vst.msk [vmem:[%s3619_s5 + $0x58] sm:$0xff] %vm220_vm8, %v2717_v18  ;;  %v2711_v4 = vadd.f32 %v2678_v17, %v2483_v54  ;;  %v2632_v46 = vpop.f32.mrf.mxu0 }
 0x20f   : > { %2746 = vst [vmem:[%s3619_s5 + $0x80] sm:$0xff] %v2722_v53  ;;  %v2724_v5 = vadd.f32 %v2632_v46, %v2444_v19  ;;  %v3170_v44 = vpop.f32.mrf.mxu1 }
 0x210   : > { %2735 = vst.msk [vmem:[%s3619_s5 + $0x28] sm:$0xff] %vm220_vm8, %v2711_v4  ;;  %v2726_v28 = vadd.f32 %v3170_v44, %v2498_v48  ;;  %v2634_v26 = vpop.f32.mrf.mxu0 }
 0x211   : > { %2748 = vst [vmem:[%s3619_s5 + $0x90] sm:$0xff] %v2724_v5  ;;  %v2725_v58 = vadd.f32 %v2634_v26, %v2445_v52  ;;  %v2691_v6 = vpop.f32.mrf.mxu1 }
 0x212   : > { %2750 = vst.msk [vmem:[%s3619_s5 + $0xa0] sm:$0xff] %vm220_vm8, %v2726_v28  ;;  %v2720_v29 = vadd.f32 %v2691_v6, %v2492_v16  ;;  %v2636_v2 = vpop.f32.mrf.mxu0 }
 0x213   : > { %2749 = vst [vmem:[%s3619_s5 + $0x98] sm:$0xff] %v2725_v58  ;;  %v2727_v8 = vadd.f32 %v2636_v2, %v2447_v42  ;;  %v3171_v10 = vpop.f32.mrf.mxu1 }
 0x214   : > { %2744 = vst.msk [vmem:[%s3619_s5 + $0x70] sm:$0xff] %vm220_vm8, %v2720_v29  ;;  %v2729_v39 = vadd.f32 %v3171_v10, %v2501_v12  ;;  %v2638_v40 = vpop.f32.mrf.mxu0 }
 0x215   : > { %2751 = vst [vmem:[%s3619_s5 + $0xa8] sm:$0xff] %v2727_v8  ;;  %v2728_v11 = vadd.f32 %v2638_v40, %v2448_v35  ;;  %v2694_v41 = vpop.f32.mrf.mxu1 }
 0x216   : > { %2753 = vst.msk [vmem:[%s3619_s5 + $0xb8] sm:$0xff] %vm220_vm8, %v2729_v39  ;;  %v2723_v32 = vadd.f32 %v2694_v41, %v2495_v57 }
 0x217   : > { %2752 = vst [vmem:[%s3619_s5 + $0xb0] sm:$0xff] %v2728_v11 }
 0x218   : > { %2747 = vst.msk [vmem:[%s3619_s5 + $0x88] sm:$0xff] %vm220_vm8, %v2723_v32 }
 0x219   : > { %3290 = shalt.err (!%p3287_p3)
}
 0x21a   : > { %s3291_s25 = scalar_lea.hbm %s4277_s29, 3072  ;;  %s3295_s9 = scalar_lea.hbm %s4331_s3, 6144 }
 0x21b   : > { %p3292_p4 = scmp.ne.s32.totalorder %s4277_s29, %s3291_s25  ;;  %p3296_p9 = scmp.lt.s32.totalorder %s4277_s29, %s4331_s3 }
 0x21c   : > { %p3297_p10 = scmp.lt.s32.totalorder %s3295_s9, %s3291_s25 }
 0x21d   : > { %p3293_p7 = pnand %p3292_p4, %p3409_p5 }
 0x21e   : > { %p3298_p11 = por %p3297_p10, %p3296_p9 }
 0x21f   : > { %p3294_p8 = pneg %p3293_p7 }
 0x221   : > { %p3299_p12 = pnand %p3298_p11, %p3294_p8 }
 0x223   : > { %3302 = shalt.err (!%p3299_p12)
}
 0x224   : > { %s3349_s17 = smov 384   ;;  %s3350_s19 = smov 24  }
 0x225   : > { %3177 = dma.vmem_to_hbm [thread:$0]  (%p3409_p5), %s4279_s26, 3072, %s4277_s29, %s4288_s30, %s3349_s17, %s3349_s17, %s3350_s19  }
 0x226 PF: > { %p3183_p13 = scmp.ge.s32.totalorder %s3337_s15, 2  ;;  %s2783_s20 = sand.u32 1, %s3325_s12  }
 0x227   : > { %s2784_s24 = scalar_lea.sflag [#allocation3], %s2783_s20 }
 0x228   : > { %p3180_p0 = pnand %p3183_p13, %p3413_p6 }
 0x22a   : > { %p3181_p1 = pneg %p3180_p0 }
 0x22c   : > { %3320 = dma.done.wait (%p3181_p1), %s2784_s24, 3072  }
 0x22d   : > { %3322 = vsyncadd (%p3181_p1), %s2784_s24, 4294964224  ;;  %p13_p2 = scmp.ge.s32.totalorder %s3396_s18, 4   ;;  %s4340_s12 = smov %s3329_s13 }
 0x22e   : > { %s4341_s13 = smov %s3333_s14  ;;  %s4342_s14 = smov %s3407_s21 }
 0x22f   : > { %s4343_s15 = smov %s3396_s18  ;;  %15 = sbr.rel (!%p13_p2) target bundleno = 3 (0x3), region = 75 }
 0x234   :  { %2789 = vsyncpa [#allocation3], 1 }
 0x235   :  { %2791 = vsyncpa [#allocation3 + $0x1], 1 }

</bundles_post_ra>
